<compile_context>
chip_gen: v6e
topology: v6e:2x2x1
jax: 0.10.0
libtpu: 0.0.40
codegen_flags: <defaults>
</compile_context>

<pallas_src>
import math

import jax
import jax.numpy as jnp
import numpy as np
from jax.experimental import pallas as pl
from jax.experimental.pallas import tpu as pltpu

_OUT_LANES = 128          # lane-dense output width (7 real pooling columns + zero padding)
_EPS = 1e-5               # norm epsilon (clamped as eps^2 on the squared sum)


# ---------------------------------------------------------------------------
# Fused kernel: Linear -> sin -> ScaleNorm -> Linear -> sin -> FixNorm -> AdaptivePool(7)
# operates on a (tile_rows, D) block of the flattened (B*N, D) activations.
# ---------------------------------------------------------------------------
def _gen_params_kernel(x_ref, w1t_ref, b1_ref, w2t_ref, b2_ref, pool_ref, g_ref, o_ref):
    g = g_ref[0]                                           # ScaleNorm scale (SMEM scalar)

    # Linear1 + Sine (bf16 MXU operands, f32 accumulation)
    x = x_ref[...].astype(jnp.bfloat16)
    h = jnp.sin(jnp.dot(x, w1t_ref[...], preferred_element_type=jnp.float32)
                + b1_ref[...])

    # ScaleNorm (Dropout after it is identity in eval): g * h / max(||h||, eps)
    ss1 = jnp.sum(h * h, axis=-1, keepdims=True)
    inv1 = jax.lax.rsqrt(jnp.maximum(ss1, _EPS * _EPS))    # EUP; == 1/max(||h||, eps)
    h = h * (g * inv1)                                     # one broadcast multiply

    # Linear2 + Sine
    h2 = jnp.sin(jnp.dot(h.astype(jnp.bfloat16), w2t_ref[...],
                         preferred_element_type=jnp.float32)
                 + b2_ref[...])

    # FixNorm: h2 / max(||h2||, eps)
    ss2 = jnp.sum(h2 * h2, axis=-1, keepdims=True)
    p = h2 * jax.lax.rsqrt(jnp.maximum(ss2, _EPS * _EPS))

    # AdaptiveAvgPool1d(7) over the feature dim as a matmul with the lane-padded (D, 128)
    # constant matrix.  Kept f32: it is tiny next to the (D,D) dots and avoids adding
    # pool-coefficient quantization error; the 128-wide result gives an unmasked store.
    o_ref[...] = jnp.dot(p, pool_ref[...], preferred_element_type=jnp.float32)


# ---------------------------------------------------------------------------
# Helpers
# ---------------------------------------------------------------------------
def _round_up(x, m):
    return ((x + m - 1) // m) * m


def _vmem_limit_bytes():
    """Generation-aware scoped-VMEM limit (v7x: ~48 MiB of 64; v5e/v6e: ~96 of 128)."""
    cap = 64 * 1024 * 1024                      # conservative fallback (v7x per-TC size)
    try:
        info = pltpu.get_tpu_info()
        cap = int(getattr(info, "vmem_capacity_bytes", cap))
    except Exception:
        pass
    return min((cap * 3) // 4, 100 * 1024 * 1024)


def _row_tiling(rows, d, vmem_limit):
    """Pick an MXU/sublane-aligned row tile sized against the VMEM budget.

    Budget model: single-buffered constants (two bf16 DxD weights, two biases, f32
    (D,128) pool matrix) + per-row bytes of the double-buffered x / out tiles and
    ~4 live (tile, D) f32 intermediates (h, h2, p, squares).
    """
    const_bytes = 2 * d * d * 2 + 2 * d * 4 + d * _OUT_LANES * 4
    avail = max(vmem_limit - const_bytes - 4 * 1024 * 1024, 1 * 1024 * 1024)
    per_row = (d * 4) * 2 + (_OUT_LANES * 4) * 2 + 4 * (d * 4)
    cap = max(8, (avail // per_row) // 8 * 8)

    target = 512 if rows >= 2048 else (256 if rows >= 512 else 128)
    tile = min(target, cap)
    tile = (tile // 128) * 128 if tile >= 128 else max(8, (tile // 8) * 8)

    # Never exceed the (8-aligned) row count; keep >=2 grid steps when possible so both
    # v7x TensorCores stay busy (per-step overhead ~0.35us is negligible then).
    tile = min(tile, _round_up(rows, 8))
    if rows > 8:
        tile = min(tile, max(8, _round_up(_round_up(rows, 8) // 2, 8)))

    # Prefer an even grid count (balanced split across the two v7x cores).
    grid = pl.cdiv(rows, tile)
    if grid > 1 and grid % 2 == 1:
        step = 128 if tile >= 256 else 8
        for cand in range(tile, 7, -step):
            if pl.cdiv(rows, cand) % 2 == 0:
                tile = cand
                break
    return tile, pl.cdiv(rows, tile)


def _adaptive_pool_matrix(d, out_size, lanes):
    """(d, lanes) matrix reproducing torch.nn.AdaptiveAvgPool1d(out_size), zero-padded."""
    assert out_size <= lanes
    m = np.zeros((d, lanes), np.float32)
    for k in range(out_size):
        start = (k * d) // out_size
        end = -(-((k + 1) * d) // out_size)   # ceil
        m[start:end, k] = 1.0 / (end - start)
    return jnp.asarray(m)


# ---------------------------------------------------------------------------
# Forward wrapper (parameter plumbing + the cheap view/chunk/slice epilogue)
# ---------------------------------------------------------------------------
def generate_parameters_forward(x, w1t, b1, w2t, b2, scale, *, single_buffer_consts=True):
    """x: (B, N, D) f32.  w1t / w2t: (D, D) PRE-TRANSPOSED weights (in-dim, out-dim),
    ideally stored bf16 at init.  b1 / b2: (D,) f32.  scale: (1,) f32 ScaleNorm g."""
    B, N, D = x.shape
    rows = B * N

    vmem_limit = _vmem_limit_bytes()
    tile, grid = _row_tiling(rows, D, vmem_limit)

    x2d = x.reshape(rows, D)                  # no pad: Pallas clips the ragged tail block
    pool_mat = _adaptive_pool_matrix(D, 7, _OUT_LANES)

    w1t_bf = w1t.astype(jnp.bfloat16)         # no-op if already stored bf16 at init
    w2t_bf = w2t.astype(jnp.bfloat16)
    b1_2d = b1.reshape(1, D).astype(jnp.float32)
    b2_2d = b2.reshape(1, D).astype(jnp.float32)
    g = jnp.asarray(scale, jnp.float32).reshape(-1)

    def const_spec(shape):
        # Constant block index => the operand never changes; single-buffer it so it is
        # DMA'd once and consumes half the VMEM (frees room for a larger row tile).
        if single_buffer_consts:
            return pl.BlockSpec(shape, lambda i, n=len(shape): (0,) * n,
                                pipeline_mode=pl.Buffered(1))
        return pl.BlockSpec(shape, lambda i, n=len(shape): (0,) * n)

    out = pl.pallas_call(
        _gen_params_kernel,
        out_shape=jax.ShapeDtypeStruct((rows, _OUT_LANES), jnp.float32),
        grid=(grid,),
        in_specs=[
            pl.BlockSpec((tile, D), lambda i: (i, 0)),          # x rows (double-buffered)
            const_spec((D, D)),                                 # W1^T (bf16, resident)
            const_spec((1, D)),                                 # b1
            const_spec((D, D)),                                 # W2^T (bf16, resident)
            const_spec((1, D)),                                 # b2
            const_spec((D, _OUT_LANES)),                        # lane-padded pool matrix
            pl.BlockSpec(memory_space=pltpu.MemorySpace.SMEM),  # ScaleNorm g (scalar)
        ],
        out_specs=pl.BlockSpec((tile, _OUT_LANES), lambda i: (i, 0)),
        compiler_params=pltpu.CompilerParams(
            dimension_semantics=("parallel",),
            vmem_limit_bytes=vmem_limit,
        ),
    )(x2d, w1t_bf, b1_2d, w2t_bf, b2_2d, pool_mat, g)

    # Epilogue == torch: pool(parameters).view(b, 7*n).chunk(7, dim=1) + slicing.
    flat = out[:, :7].reshape(B, 7 * N)       # drop lane padding; (B*N,7) -> (B, N*7)
    ch = [flat[:, i * N:(i + 1) * N] for i in range(7)]
    alpha_l, beta_l, gamma_l = ch[0][:, :-1], ch[1][:, :-1], ch[2][:, :-1]
    alpha_u, beta_u, gamma_u = ch[3][:, 1:], ch[4][:, 1:], ch[5][:, 1:]
    theta = ch[6]
    return alpha_l, beta_l, gamma_l, alpha_u, beta_u, gamma_u, theta


# ---------------------------------------------------------------------------
# Pure-JAX reference (for correctness sanity checks).  `w*t` are pre-transposed.
# matmul_dtype=None -> f32 HIGHEST (module semantics); =bf16 -> emulates the kernel's MXU.
# ---------------------------------------------------------------------------
def _reference_forward(x, w1t, b1, w2t, b2, scale, matmul_dtype=None):
    hp = jax.lax.Precision.HIGHEST

    def mm(a, w):
        if matmul_dtype is not None:
            return jnp.matmul(a.astype(matmul_dtype), w.astype(matmul_dtype),
                              preferred_element_type=jnp.float32)
        return jnp.matmul(a, w.astype(jnp.float32), precision=hp,
                          preferred_element_type=jnp.float32)

    B, N, D = x.shape
    h = jnp.sin(mm(x, w1t) + b1)
    n1 = jnp.maximum(jnp.linalg.norm(h, axis=-1, keepdims=True), _EPS)
    h = scale[0] * h / n1
    h2 = jnp.sin(mm(h, w2t) + b2)
    n2 = jnp.maximum(jnp.linalg.norm(h2, axis=-1, keepdims=True), _EPS)
    p = h2 / n2
    cols = []
    for k in range(7):
        s = (k * D) // 7
        e = -(-((k + 1) * D) // 7)
        cols.append(jnp.mean(p[..., s:e], axis=-1))
    pooled = jnp.stack(cols, axis=-1)
    flat = pooled.reshape(B, 7 * N)
    ch = [flat[:, i * N:(i + 1) * N] for i in range(7)]
    return (ch[0][:, :-1], ch[1][:, :-1], ch[2][:, :-1],
            ch[3][:, 1:], ch[4][:, 1:], ch[5][:, 1:], ch[6])


# ---------------------------------------------------------------------------
# Deterministic init (matches GenerateParameters.reset_parameters).
# Weights are stored pre-transposed + bf16 ONCE here so the jitted forward does no
# per-call transpose / cast HBM round trips.
# ---------------------------------------------------------------------------
def init_params(key, D):
    k1, k2 = jax.random.split(key, 2)
    bound = math.sqrt(6.0 / D)
    w1 = jax.random.uniform(k1, (D, D), jnp.float32, -bound, bound)   # torch layout (out,in)
    w2 = jax.random.uniform(k2, (D, D), jnp.float32, -bound, bound)
    return {
        "w1t": jnp.asarray(w1.T, jnp.bfloat16),        # kernel-consumable form
        "w2t": jnp.asarray(w2.T, jnp.bfloat16),
        "b1": jnp.zeros((D,), jnp.float32),
        "b2": jnp.zeros((D,), jnp.float32),
        "scale": jnp.full((1,), math.sqrt(D), jnp.float32),   # ScaleNorm g
        # f32 pre-transposed copies kept only for the reference check below.
        "w1t_f32": jnp.asarray(w1.T, jnp.float32),
        "w2t_f32": jnp.asarray(w2.T, jnp.float32),
    }


if __name__ == "__main__":
    B, N, D = 2, 8, 32
    key = jax.random.PRNGKey(0)
    kx, kp = jax.random.split(key)
    x = jax.random.normal(kx, (B, N, D), jnp.float32)
    prm = init_params(kp, D)

    args = (x, prm["w1t"], prm["b1"], prm["w2t"], prm["b2"], prm["scale"])
    fwd = jax.jit(generate_parameters_forward, static_argnames=("single_buffer_consts",))

    try:
        outs = jax.block_until_ready(fwd(*args, single_buffer_consts=True))
    except Exception:
        # TODO(synk): pl.Buffered(1) single-buffering of constant operands not supported on
        # this jax/Mosaic version -- fall back to default double-buffered constants.
        outs = jax.block_until_ready(fwd(*args, single_buffer_consts=False))

    # Tight check against a reference that emulates the kernel's bf16 MXU operands.
    ref_bf = _reference_forward(x, prm["w1t"], prm["b1"], prm["w2t"], prm["b2"],
                                prm["scale"], matmul_dtype=jnp.bfloat16)
    # Module-semantics (full f32) check; looser tolerance accounts for bf16 MXU operands.
    ref_f32 = _reference_forward(x, prm["w1t_f32"], prm["b1"], prm["w2t_f32"], prm["b2"],
                                 prm["scale"])

    expected_shapes = [(B, N - 1)] * 6 + [(B, N)]
    for got, want_bf, want_f32, shp in zip(outs, ref_bf, ref_f32, expected_shapes):
        assert got.shape == shp, (got.shape, shp)
        assert bool(jnp.all(jnp.isfinite(got)))
        assert bool(jnp.allclose(got, want_bf, atol=5e-3, rtol=5e-3))
        assert bool(jnp.allclose(got, want_f32, atol=3e-2, rtol=3e-2))

    print("KERNEL_OK")
</pallas_src>

<mosaic_0001>
module attributes {stable_mosaic.version = 11 : i64} {
  func.func @_gen_params_kernel(%arg0: i32, %arg1: memref<8x32xf32, #tpu.memory_space<vmem>>, %arg2: memref<32x32xbf16, #tpu.memory_space<vmem>>, %arg3: memref<1x32xf32, #tpu.memory_space<vmem>>, %arg4: memref<32x32xbf16, #tpu.memory_space<vmem>>, %arg5: memref<1x32xf32, #tpu.memory_space<vmem>>, %arg6: memref<32x128xf32, #tpu.memory_space<vmem>>, %arg7: memref<1xf32, #tpu.memory_space<smem>>, %arg8: memref<8x128xf32, #tpu.memory_space<vmem>>) attributes {dimension_semantics = [#tpu.dimension_semantics<parallel>], iteration_bounds = array<i64: 2>, scalar_prefetch = 0 : i64, scratch_operands = 0 : i64, tpu.core_type = #tpu.core_type<tc>, window_params = [{transform_indices = @transform_0, window_bounds = array<i64: 8, 32>}, {pipeline_mode = #tpu.pipeline_mode<synchronous>, transform_indices = @transform_1, window_bounds = array<i64: 32, 32>}, {pipeline_mode = #tpu.pipeline_mode<synchronous>, transform_indices = @transform_2, window_bounds = array<i64: 1, 32>}, {pipeline_mode = #tpu.pipeline_mode<synchronous>, transform_indices = @transform_3, window_bounds = array<i64: 32, 32>}, {pipeline_mode = #tpu.pipeline_mode<synchronous>, transform_indices = @transform_4, window_bounds = array<i64: 1, 32>}, {pipeline_mode = #tpu.pipeline_mode<synchronous>, transform_indices = @transform_5, window_bounds = array<i64: 32, 128>}, {transform_indices = @transform_6, window_bounds = array<i64: 1>}, {transform_indices = @transform_7, window_bounds = array<i64: 8, 128>}]} {
    %c0 = arith.constant 0 : index
    %0 = memref.load %arg7[%c0] : memref<1xf32, #tpu.memory_space<smem>>
    %c0_0 = arith.constant 0 : index
    %c0_1 = arith.constant 0 : index
    %1 = vector.load %arg1[%c0_0, %c0_1] : memref<8x32xf32, #tpu.memory_space<vmem>>, vector<8x32xf32>
    %2 = arith.truncf %1 : vector<8x32xf32> to vector<8x32xbf16>
    %c0_2 = arith.constant 0 : index
    %c0_3 = arith.constant 0 : index
    %3 = vector.load %arg2[%c0_2, %c0_3] : memref<32x32xbf16, #tpu.memory_space<vmem>>, vector<32x32xbf16>
    %cst = arith.constant dense<0.000000e+00> : vector<8x32xf32>
    %4 = tpu.matmul %2, %3, %cst {dimension_numbers = #tpu.dot_dimension_numbers<[1], [0], [0], [1], [0, 0, 1, 1], [], []>} : vector<8x32xbf16>, vector<32x32xbf16>, vector<8x32xf32> -> vector<8x32xf32>
    %c0_4 = arith.constant 0 : index
    %c0_5 = arith.constant 0 : index
    %5 = vector.load %arg3[%c0_4, %c0_5] : memref<1x32xf32, #tpu.memory_space<vmem>>, vector<1x32xf32>
    %6 = vector.broadcast %5 : vector<1x32xf32> to vector<8x32xf32>
    %7 = arith.addf %4, %6 : vector<8x32xf32>
    %8 = math.sin %7 : vector<8x32xf32>
    %9 = arith.mulf %8, %8 : vector<8x32xf32>
    %cst_6 = arith.constant dense<0.000000e+00> : vector<8xf32>
    %10 = vector.multi_reduction <add>, %9, %cst_6 [1] : vector<8x32xf32> to vector<8xf32>
    %11 = vector.shape_cast %10 : vector<8xf32> to vector<8x1xf32>
    %cst_7 = arith.constant 1.000000e-10 : f32
    %12 = vector.broadcast %cst_7 : f32 to vector<8x1xf32>
    %13 = arith.maximumf %11, %12 : vector<8x1xf32>
    %14 = math.rsqrt %13 : vector<8x1xf32>
    %15 = vector.broadcast %0 : f32 to vector<8x1xf32>
    %16 = arith.mulf %15, %14 : vector<8x1xf32>
    %17 = vector.broadcast %16 : vector<8x1xf32> to vector<8x32xf32>
    %18 = arith.mulf %8, %17 : vector<8x32xf32>
    %19 = arith.truncf %18 : vector<8x32xf32> to vector<8x32xbf16>
    %c0_8 = arith.constant 0 : index
    %c0_9 = arith.constant 0 : index
    %20 = vector.load %arg4[%c0_8, %c0_9] : memref<32x32xbf16, #tpu.memory_space<vmem>>, vector<32x32xbf16>
    %cst_10 = arith.constant dense<0.000000e+00> : vector<8x32xf32>
    %21 = tpu.matmul %19, %20, %cst_10 {dimension_numbers = #tpu.dot_dimension_numbers<[1], [0], [0], [1], [0, 0, 1, 1], [], []>} : vector<8x32xbf16>, vector<32x32xbf16>, vector<8x32xf32> -> vector<8x32xf32>
    %c0_11 = arith.constant 0 : index
    %c0_12 = arith.constant 0 : index
    %22 = vector.load %arg5[%c0_11, %c0_12] : memref<1x32xf32, #tpu.memory_space<vmem>>, vector<1x32xf32>
    %23 = vector.broadcast %22 : vector<1x32xf32> to vector<8x32xf32>
    %24 = arith.addf %21, %23 : vector<8x32xf32>
    %25 = math.sin %24 : vector<8x32xf32>
    %26 = arith.mulf %25, %25 : vector<8x32xf32>
    %cst_13 = arith.constant dense<0.000000e+00> : vector<8xf32>
    %27 = vector.multi_reduction <add>, %26, %cst_13 [1] : vector<8x32xf32> to vector<8xf32>
    %28 = vector.shape_cast %27 : vector<8xf32> to vector<8x1xf32>
    %cst_14 = arith.constant 1.000000e-10 : f32
    %29 = vector.broadcast %cst_14 : f32 to vector<8x1xf32>
    %30 = arith.maximumf %28, %29 : vector<8x1xf32>
    %31 = math.rsqrt %30 : vector<8x1xf32>
    %32 = vector.broadcast %31 : vector<8x1xf32> to vector<8x32xf32>
    %33 = arith.mulf %25, %32 : vector<8x32xf32>
    %c0_15 = arith.constant 0 : index
    %c0_16 = arith.constant 0 : index
    %34 = vector.load %arg6[%c0_15, %c0_16] : memref<32x128xf32, #tpu.memory_space<vmem>>, vector<32x128xf32>
    %cst_17 = arith.constant dense<0.000000e+00> : vector<8x128xf32>
    %35 = tpu.matmul %33, %34, %cst_17 {dimension_numbers = #tpu.dot_dimension_numbers<[1], [0], [0], [1], [0, 0, 1, 1], [], []>} : vector<8x32xf32>, vector<32x128xf32>, vector<8x128xf32> -> vector<8x128xf32>
    %c0_18 = arith.constant 0 : index
    %c0_19 = arith.constant 0 : index
    %36 = vector.load %arg8[%c0_18, %c0_19] : memref<8x128xf32, #tpu.memory_space<vmem>>, vector<8x128xf32>
    tpu.vector_store %arg8[%c0_18, %c0_19], %35 {strides = array<i32>} : memref<8x128xf32, #tpu.memory_space<vmem>>, vector<8x128xf32>,
    return
  }
  func.func @transform_0(%arg0: i32) -> (i32, i32) {
    %c0_i32 = arith.constant 0 : i32
    %c0_i32_0 = arith.constant 0 : i32
    return %arg0, %c0_i32 : i32, i32
  }
  func.func @transform_1(%arg0: i32) -> (i32, i32) {
    %c0_i32 = arith.constant 0 : i32
    %c0_i32_0 = arith.constant 0 : i32
    %c0_i32_1 = arith.constant 0 : i32
    return %c0_i32, %c0_i32_0 : i32, i32
  }
  func.func @transform_2(%arg0: i32) -> (i32, i32) {
    %c0_i32 = arith.constant 0 : i32
    %c0_i32_0 = arith.constant 0 : i32
    %c0_i32_1 = arith.constant 0 : i32
    return %c0_i32, %c0_i32_0 : i32, i32
  }
  func.func @transform_3(%arg0: i32) -> (i32, i32) {
    %c0_i32 = arith.constant 0 : i32
    %c0_i32_0 = arith.constant 0 : i32
    %c0_i32_1 = arith.constant 0 : i32
    return %c0_i32, %c0_i32_0 : i32, i32
  }
  func.func @transform_4(%arg0: i32) -> (i32, i32) {
    %c0_i32 = arith.constant 0 : i32
    %c0_i32_0 = arith.constant 0 : i32
    %c0_i32_1 = arith.constant 0 : i32
    return %c0_i32, %c0_i32_0 : i32, i32
  }
  func.func @transform_5(%arg0: i32) -> (i32, i32) {
    %c0_i32 = arith.constant 0 : i32
    %c0_i32_0 = arith.constant 0 : i32
    %c0_i32_1 = arith.constant 0 : i32
    return %c0_i32, %c0_i32_0 : i32, i32
  }
  func.func @transform_6(%arg0: i32) -> i32 {
    %c0_i32 = arith.constant 0 : i32
    %c0_i32_0 = arith.constant 0 : i32
    return %c0_i32 : i32
  }
  func.func @transform_7(%arg0: i32) -> (i32, i32) {
    %c0_i32 = arith.constant 0 : i32
    %c0_i32_0 = arith.constant 0 : i32
    return %arg0, %c0_i32 : i32, i32
  }
}

module attributes {stable_mosaic.version = 11 : i64} {
  func.func @_gen_params_kernel(%arg0: i32, %arg1: memref<8x32xf32, #tpu.memory_space<vmem>>, %arg2: memref<32x32xbf16, #tpu.memory_space<vmem>>, %arg3: memref<1x32xf32, #tpu.memory_space<vmem>>, %arg4: memref<32x32xbf16, #tpu.memory_space<vmem>>, %arg5: memref<1x32xf32, #tpu.memory_space<vmem>>, %arg6: memref<32x128xf32, #tpu.memory_space<vmem>>, %arg7: memref<1xf32, #tpu.memory_space<smem>>, %arg8: memref<8x128xf32, #tpu.memory_space<vmem>>) attributes {dimension_semantics = [#tpu.dimension_semantics<parallel>], iteration_bounds = array<i64: 2>, scalar_prefetch = 0 : i64, scratch_operands = 0 : i64, tpu.core_type = #tpu.core_type<tc>, window_params = [{transform_indices = @transform_0, window_bounds = array<i64: 8, 32>}, {pipeline_mode = #tpu.pipeline_mode<synchronous>, transform_indices = @transform_1, window_bounds = array<i64: 32, 32>}, {pipeline_mode = #tpu.pipeline_mode<synchronous>, transform_indices = @transform_2, window_bounds = array<i64: 1, 32>}, {pipeline_mode = #tpu.pipeline_mode<synchronous>, transform_indices = @transform_3, window_bounds = array<i64: 32, 32>}, {pipeline_mode = #tpu.pipeline_mode<synchronous>, transform_indices = @transform_4, window_bounds = array<i64: 1, 32>}, {pipeline_mode = #tpu.pipeline_mode<synchronous>, transform_indices = @transform_5, window_bounds = array<i64: 32, 128>}, {transform_indices = @transform_6, window_bounds = array<i64: 1>}, {transform_indices = @transform_7, window_bounds = array<i64: 8, 128>}]} {
    %c0 = arith.constant 0 : index
    %0 = memref.load %arg7[%c0] : memref<1xf32, #tpu.memory_space<smem>>
    %c0_0 = arith.constant 0 : index
    %c0_1 = arith.constant 0 : index
    %1 = vector.load %arg1[%c0_0, %c0_1] : memref<8x32xf32, #tpu.memory_space<vmem>>, vector<8x32xf32>
    %2 = arith.truncf %1 : vector<8x32xf32> to vector<8x32xbf16>
    %c0_2 = arith.constant 0 : index
    %c0_3 = arith.constant 0 : index
    %3 = vector.load %arg2[%c0_2, %c0_3] : memref<32x32xbf16, #tpu.memory_space<vmem>>, vector<32x32xbf16>
    %cst = arith.constant dense<0.000000e+00> : vector<8x32xf32>
    %4 = tpu.matmul %2, %3, %cst {dimension_numbers = #tpu.dot_dimension_numbers<[1], [0], [0], [1], [0, 0, 1, 1], [], []>} : vector<8x32xbf16>, vector<32x32xbf16>, vector<8x32xf32> -> vector<8x32xf32>
    %c0_4 = arith.constant 0 : index
    %c0_5 = arith.constant 0 : index
    %5 = vector.load %arg3[%c0_4, %c0_5] : memref<1x32xf32, #tpu.memory_space<vmem>>, vector<1x32xf32>
    %6 = vector.broadcast %5 : vector<1x32xf32> to vector<8x32xf32>
    %7 = arith.addf %4, %6 : vector<8x32xf32>
    %8 = math.sin %7 : vector<8x32xf32>
    %9 = arith.mulf %8, %8 : vector<8x32xf32>
    %cst_6 = arith.constant dense<0.000000e+00> : vector<8xf32>
    %10 = vector.multi_reduction <add>, %9, %cst_6 [1] : vector<8x32xf32> to vector<8xf32>
    %11 = vector.shape_cast %10 : vector<8xf32> to vector<8x1xf32>
    %cst_7 = arith.constant 1.000000e-10 : f32
    %12 = vector.broadcast %cst_7 : f32 to vector<8x1xf32>
    %13 = arith.maximumf %11, %12 : vector<8x1xf32>
    %14 = math.rsqrt %13 : vector<8x1xf32>
    %15 = vector.broadcast %0 : f32 to vector<8x1xf32>
    %16 = arith.mulf %15, %14 : vector<8x1xf32>
    %17 = vector.broadcast %16 : vector<8x1xf32> to vector<8x32xf32>
    %18 = arith.mulf %8, %17 : vector<8x32xf32>
    %19 = arith.truncf %18 : vector<8x32xf32> to vector<8x32xbf16>
    %c0_8 = arith.constant 0 : index
    %c0_9 = arith.constant 0 : index
    %20 = vector.load %arg4[%c0_8, %c0_9] : memref<32x32xbf16, #tpu.memory_space<vmem>>, vector<32x32xbf16>
    %cst_10 = arith.constant dense<0.000000e+00> : vector<8x32xf32>
    %21 = tpu.matmul %19, %20, %cst_10 {dimension_numbers = #tpu.dot_dimension_numbers<[1], [0], [0], [1], [0, 0, 1, 1], [], []>} : vector<8x32xbf16>, vector<32x32xbf16>, vector<8x32xf32> -> vector<8x32xf32>
    %c0_11 = arith.constant 0 : index
    %c0_12 = arith.constant 0 : index
    %22 = vector.load %arg5[%c0_11, %c0_12] : memref<1x32xf32, #tpu.memory_space<vmem>>, vector<1x32xf32>
    %23 = vector.broadcast %22 : vector<1x32xf32> to vector<8x32xf32>
    %24 = arith.addf %21, %23 : vector<8x32xf32>
    %25 = math.sin %24 : vector<8x32xf32>
    %26 = arith.mulf %25, %25 : vector<8x32xf32>
    %cst_13 = arith.constant dense<0.000000e+00> : vector<8xf32>
    %27 = vector.multi_reduction <add>, %26, %cst_13 [1] : vector<8x32xf32> to vector<8xf32>
    %28 = vector.shape_cast %27 : vector<8xf32> to vector<8x1xf32>
    %cst_14 = arith.constant 1.000000e-10 : f32
    %29 = vector.broadcast %cst_14 : f32 to vector<8x1xf32>
    %30 = arith.maximumf %28, %29 : vector<8x1xf32>
    %31 = math.rsqrt %30 : vector<8x1xf32>
    %32 = vector.broadcast %31 : vector<8x1xf32> to vector<8x32xf32>
    %33 = arith.mulf %25, %32 : vector<8x32xf32>
    %c0_15 = arith.constant 0 : index
    %c0_16 = arith.constant 0 : index
    %34 = vector.load %arg6[%c0_15, %c0_16] : memref<32x128xf32, #tpu.memory_space<vmem>>, vector<32x128xf32>
    %cst_17 = arith.constant dense<0.000000e+00> : vector<8x128xf32>
    %35 = tpu.matmul %33, %34, %cst_17 {dimension_numbers = #tpu.dot_dimension_numbers<[1], [0], [0], [1], [0, 0, 1, 1], [], []>} : vector<8x32xf32>, vector<32x128xf32>, vector<8x128xf32> -> vector<8x128xf32>
    %c0_18 = arith.constant 0 : index
    %c0_19 = arith.constant 0 : index
    %36 = vector.load %arg8[%c0_18, %c0_19] : memref<8x128xf32, #tpu.memory_space<vmem>>, vector<8x128xf32>
    tpu.vector_store %arg8[%c0_18, %c0_19], %35 {strides = array<i32>} : memref<8x128xf32, #tpu.memory_space<vmem>>, vector<8x128xf32>,
    return
  }
  func.func @transform_0(%arg0: i32) -> (i32, i32) {
    %c0_i32 = arith.constant 0 : i32
    %c0_i32_0 = arith.constant 0 : i32
    return %arg0, %c0_i32 : i32, i32
  }
  func.func @transform_1(%arg0: i32) -> (i32, i32) {
    %c0_i32 = arith.constant 0 : i32
    %c0_i32_0 = arith.constant 0 : i32
    %c0_i32_1 = arith.constant 0 : i32
    return %c0_i32, %c0_i32_0 : i32, i32
  }
  func.func @transform_2(%arg0: i32) -> (i32, i32) {
    %c0_i32 = arith.constant 0 : i32
    %c0_i32_0 = arith.constant 0 : i32
    %c0_i32_1 = arith.constant 0 : i32
    return %c0_i32, %c0_i32_0 : i32, i32
  }
  func.func @transform_3(%arg0: i32) -> (i32, i32) {
    %c0_i32 = arith.constant 0 : i32
    %c0_i32_0 = arith.constant 0 : i32
    %c0_i32_1 = arith.constant 0 : i32
    return %c0_i32, %c0_i32_0 : i32, i32
  }
  func.func @transform_4(%arg0: i32) -> (i32, i32) {
    %c0_i32 = arith.constant 0 : i32
    %c0_i32_0 = arith.constant 0 : i32
    %c0_i32_1 = arith.constant 0 : i32
    return %c0_i32, %c0_i32_0 : i32, i32
  }
  func.func @transform_5(%arg0: i32) -> (i32, i32) {
    %c0_i32 = arith.constant 0 : i32
    %c0_i32_0 = arith.constant 0 : i32
    %c0_i32_1 = arith.constant 0 : i32
    return %c0_i32, %c0_i32_0 : i32, i32
  }
  func.func @transform_6(%arg0: i32) -> i32 {
    %c0_i32 = arith.constant 0 : i32
    %c0_i32_0 = arith.constant 0 : i32
    return %c0_i32 : i32
  }
  func.func @transform_7(%arg0: i32) -> (i32, i32) {
    %c0_i32 = arith.constant 0 : i32
    %c0_i32_0 = arith.constant 0 : i32
    return %arg0, %c0_i32 : i32, i32
  }
}

</mosaic_0001>

<bundles_post_ra>
// kernel: generate_parameters_forward.1
= control target key start
LH: loop header
LB: loop body
LE: loop exit
PB: predicated region body
PF: predicated region fallthrough
CT: control target
= control target key end

     0   :  { %s1485_s0 = inlined_call_operand.hbm [shape: f32[16,32], index: 0, kind: input, shape index: {}]   ;;  %s1486_s1 = inlined_call_operand.hbm [shape: bf16[32,32], index: 1, kind: input, shape index: {}]   ;;  %s1487_s2 = inlined_call_operand.vmem [shape: f32[1,32], index: 2, kind: input, shape index: {}]   ;;  %s1488_s3 = inlined_call_operand.hbm [shape: bf16[32,32], index: 3, kind: input, shape index: {}]   ;;  %s1489_s4 = inlined_call_operand.vmem [shape: f32[1,32], index: 4, kind: input, shape index: {}]   ;;  %s1490_s5 = inlined_call_operand.hbm [shape: f32[32,128], index: 5, kind: input, shape index: {}]   ;;  %s1491_s6 = inlined_call_operand.<no memory space> [shape: f32[1], index: 6, kind: input, shape index: {}]   ;;  %s1492_s7 = inlined_call_operand.vmem [shape: f32[16,128], index: 7, kind: output, shape index: {}]  }
   0x1   :  { %12 = sst [smem:[#allocation2]] %s1491_s6 }
   0x2   :  { %13 = vsyncpa [#allocation4], 0 }
   0x3   :  { %15 = vsyncpa [#allocation4 + $0x1], 0 }
   0x4   :  { %16 = vsyncpa [#allocation6], 0 }
   0x5   :  { %17 = vsyncpa [#allocation9], 0  ;;  %s1259_s26 = smov 0   ;;  %s1261_s27 = smov 0  }
   0x6   :  { %s1263_s28 = smov 0   ;;  %s1265_s29 = smov 0  }
   0x7 LB: > { %s1278_s6 = sadd.s32 4294967295, %s1198_s29   ;;  %p43_p0 = scmp.ne.s32.totalorder %s1190_s27, %s1186_s26  ;;  %s1198_s29 = sphi %s1265_s29, %s1509_s29   ;;  %s1194_s28 = sphi %s1263_s28, %s1508_s28   ;;  %s1190_s27 = sphi %s1261_s27, %s1507_s27   ;;  %s1186_s26 = sphi %s1259_s26, %s1506_s26  }
   0x8   : > { %p1493_p1 = scmp.eq.s32.totalorder %s1278_s6, 0  ;;  %p874_p2 = scmp.ge.s32.totalorder %s1198_s29, 1 }
   0x9   : > { %p206_p3 = scmp.lt.s32.totalorder %s1198_s29, 3  ;;  %s1200_s9 = smov [#allocation5]  }
   0xa   : > { %p1286_p4 = por %p1493_p1, %p43_p0  ;;  %s218_s10 = sshll.u32 %s1200_s9, 4  ;;  %s219_s10 = int_to_ptr.vmem [resolvable:$true] %s218_s10 }
   0xb   : > { %p1290_p5 = pnand %p874_p2, %p206_p3  ;;  %s1201_s12 = smov [#allocation7]  }
   0xc   : > { %s1496_s30 = scalar_select %p1286_p4, 1, 0 }
   0xd   : > { %s1497_s8 = scalar_select %p1290_p5, 1, 0 }
   0xe   : > { %p966_p6 = pneg %p1290_p5  ;;  %s234_s13 = sshll.u32 %s1201_s12, 4  ;;  %s235_s13 = int_to_ptr.vmem [resolvable:$true] %s234_s13 }
   0xf   : > { %s1202_s14 = smov [#allocation8]   ;;  %s1061_s16 = scalar_lea.vmem %s219_s10, 256 }
  0x10   : > { %p1298_p7 = pnand %p966_p6, %p1493_p1  ;;  %s250_s15 = sshll.u32 %s1202_s14, 4  ;;  %s251_s15 = int_to_ptr.vmem [resolvable:$true] %s250_s15 }
  0x11   : > { %p1062_p9 = scmp.ne.s32.totalorder %s219_s10, %s1061_s16  ;;  %p1069_p12 = scmp.lt.s32.totalorder %s219_s10, %s219_s10 }
  0x12   : > { %p1052_p8 = pneg %p1298_p7  ;;  %p1070_p13 = scmp.lt.s32.totalorder %s1061_s16, %s1061_s16 }
  0x14   : > { %p1064_p10 = pnand %p1062_p9, %p1052_p8  ;;  %p1071_p0 = por %p1070_p13, %p1069_p12 }
  0x16   : > { %p1065_p11 = pneg %p1064_p10 }
  0x18   : > { %p1072_p2 = pnand %p1071_p0, %p1065_p11 }
  0x1a   : > { %1075 = shalt.err (!%p1072_p2)
}
  0x1b   : > { %s1203_s17 = smov 64   ;;  %s1204_s18 = smov 4  }
  0x1c   : > { %969 = dma.hbm_to_vmem [thread:$0]  (!%p1298_p7), %s1486_s1, 256, %s219_s10, [#allocation6], %s1203_s17, %s1203_s17, %s1204_s18  }
  0x1d   : > { %s1087_s21 = scalar_lea.vmem %s235_s13, 256  ;;  %p1095_p10 = scmp.lt.s32.totalorder %s235_s13, %s235_s13 }
  0x1e   : > { %p1088_p3 = scmp.ne.s32.totalorder %s235_s13, %s1087_s21  ;;  %p1096_p1 = scmp.lt.s32.totalorder %s1087_s21, %s1087_s21 }
  0x20   : > { %p1090_p6 = pnand %p1088_p3, %p1052_p8  ;;  %p1097_p12 = por %p1096_p1, %p1095_p10 }
  0x22   : > { %p1091_p9 = pneg %p1090_p6 }
  0x24   : > { %p1098_p11 = pnand %p1097_p12, %p1091_p9 }
  0x26   : > { %1101 = shalt.err (!%p1098_p11)
}
  0x27   : > { %972 = dma.hbm_to_vmem [thread:$0]  (!%p1298_p7), %s1488_s3, 256, %s235_s13, [#allocation6], %s1203_s17, %s1203_s17, %s1204_s18  }
  0x28   : > { %s1113_s24 = scalar_lea.vmem %s251_s15, 512  ;;  %p1121_p3 = scmp.lt.s32.totalorder %s251_s15, %s251_s15 }
  0x29   : > { %p1114_p13 = scmp.ne.s32.totalorder %s251_s15, %s1113_s24  ;;  %p1122_p6 = scmp.lt.s32.totalorder %s1113_s24, %s1113_s24 }
  0x2b   : > { %p1116_p0 = pnand %p1114_p13, %p1052_p8  ;;  %p1123_p4 = por %p1122_p6, %p1121_p3 }
  0x2d   : > { %p1117_p2 = pneg %p1116_p0 }
  0x2f   : > { %p1124_p1 = pnand %p1123_p4, %p1117_p2 }
  0x31   : > { %1127 = shalt.err (!%p1124_p1)
}
  0x32   : > { %s1205_s25 = smov 128   ;;  %s1206_s26 = smov 8  }
  0x33   : > { %975 = dma.hbm_to_vmem [thread:$0]  (!%p1298_p7), %s1490_s5, 512, %s251_s15, [#allocation9], %s1205_s25, %s1205_s25, %s1206_s26  }
  0x34   : > { %s1329_s12 = sadd.s32 1, %s1198_s29   ;;  %s30_s14 = sadd.s32 1, %s1194_s28 }
  0x35   : > { %s27_s13 = ssub.s32 %s1198_s29, %s1329_s12  ;;  %p37_p8 = scmp.ne.s32.totalorder %s1194_s28, %s1190_s27 }
  0x36   : > { %p28_p4 = scmp.eq.s32.totalorder %s27_s13, 0  ;;  %p38_p9 = scmp.eq.s32.totalorder %s1198_s29, 0 }
  0x37   : > { %p983_p10 = scmp.lt.s32.totalorder %s1198_s29, 2  ;;  %s267_s17 = sand.u32 1, %s1194_s28  }
  0x38   : > { %s1339_s16 = scalar_select %p28_p4, %s1194_s28, %s30_s14  }
  0x39   : > { %p39_p12 = por %p38_p9, %p37_p8  ;;  %s879_s18 = sshll.u32 %s267_s17, 3 }
  0x3a   : > { %s880_s19 = sshll.u32 %s1198_s29, 7  ;;  %s271_s15 = scalar_lea.vmem [#allocation3], %s879_s18 }
  0x3b   : > { %s1346_s21 = scalar_lea.hbm %s1485_s0, %s880_s19  ;;  %s278_s22 = sshll.u32 %s271_s15, 4  ;;  %s279_s22 = int_to_ptr.vmem [resolvable:$true] %s278_s22 }
  0x3c   : > { %p1348_p7 = pnand %p983_p10, %p39_p12  ;;  %s268_s24 = scalar_lea.sflag [#allocation4], %s267_s17 }
  0x3d   : > { %s1128_s25 = scalar_lea.hbm %s1346_s21, 128  ;;  %s1133_s9 = scalar_lea.hbm %s1485_s0, 256 }
  0x3e   : > { %p1129_p11 = scmp.ne.s32.totalorder %s1346_s21, %s1128_s25  ;;  %p1130_p13 = pneg %p1348_p7 }
  0x3f   : > { %p1134_p3 = scmp.lt.s32.totalorder %s1346_s21, %s1485_s0  ;;  %p1135_p6 = scmp.lt.s32.totalorder %s1133_s9, %s1128_s25 }
  0x40   : > { %p1131_p0 = pnand %p1130_p13, %p1129_p11 }
  0x41   : > { %p1136_p1 = por %p1135_p6, %p1134_p3 }
  0x42   : > { %p1132_p2 = pneg %p1131_p0 }
  0x44   : > { %p1137_p4 = pnand %p1136_p1, %p1132_p2 }
  0x46   : > { %1140 = shalt.err (!%p1137_p4)
}
  0x47   : > { %s1141_s14 = scalar_lea.vmem %s279_s22, 128  ;;  %s1207_s17 = smov [#allocation3]  }
  0x48   : > { %p1142_p8 = scmp.ne.s32.totalorder %s279_s22, %s1141_s14  ;;  %s1146_s18 = sshll.u32 %s1207_s17, 4  ;;  %s1147_s18 = int_to_ptr.vmem [resolvable:$false] %s1146_s18 }
  0x49   : > { %s1148_s19 = scalar_lea.vmem %s1147_s18, 256  ;;  %p1149_p12 = scmp.lt.s32.totalorder %s279_s22, %s1147_s18 }
  0x4a   : > { %p1144_p9 = pnand %p1142_p8, %p1130_p13  ;;  %p1150_p11 = scmp.lt.s32.totalorder %s1148_s19, %s1141_s14 }
  0x4c   : > { %p1145_p10 = pneg %p1144_p9  ;;  %p1151_p0 = por %p1150_p11, %p1149_p12 }
  0x4e   : > { %p1152_p5 = pnand %p1151_p0, %p1145_p10 }
  0x50   : > { %1155 = shalt.err (!%p1152_p5)
}
  0x51   : > { %979 = dma.hbm_to_vmem [thread:$0]  (!%p1348_p7), %s1346_s21, 128, %s279_s22, %s268_s24  }
  0x52   : > { %p1500_p2 = scmp.ne.s32.totalorder %s1497_s8, 0 }
  0x53   : > { %s289_s11 = sand.u32 (!%p1500_p2), 1, %s1190_s27   ;;  %p1501_p13 = scmp.ne.s32.totalorder (!%p1500_p2), %s1496_s30, 0 }
  0x54   : > { %287 = sbr.rel (%p1500_p2) target bundleno = 1178 (0x49a), region = 48  ;;  %s882_s20 = sshll.u32 (!%p1500_p2), %s289_s11, 3 }
  0x55   : > { %s290_s15 = scalar_lea.sflag (!%p1500_p2), [#allocation4], %s289_s11  ;;  %s293_s25 = scalar_lea.vmem (!%p1500_p2), [#allocation3], %s882_s20 }
  0x59   : > { %1173 = dma.done.wait (%p1501_p13), %s290_s15, 128  }
  0x5a   : > { %1175 = vsyncadd (%p1501_p13), %s290_s15, 4294967168  ;;  %p1502_p5 = scmp.eq.s32.totalorder %s1278_s6, 0 }
  0x5c   : > { %1177 = dma.done.wait (%p1502_p5), [#allocation6], 512   ;;  %p1503_p3 = pmov %p1502_p5 }
  0x5e   : > { %1179 = vsyncadd (%p1503_p3), [#allocation6], 4294966784  ;;  %p1504_p7 = pmov %p1503_p3 }
  0x5f   : > { %p1505_p6 = pmov %p1503_p3 }
  0x60   : > { %1181 = dma.done.wait (%p1504_p7), [#allocation9], 512  }
  0x61   : > { %1183 = vsyncadd (%p1505_p6), [#allocation9], 4294966784  ;;  %v1208_v0 = vmov 0.0   ;;  %vm1209_vm0 = vmmov 0   ;;  %v1034_v1 = vld [vmem:[#allocation5 + $0x8] sm:$0xff]   ;;  %v1035_v2 = vld [vmem:[#allocation5] sm:$0xff]  }
  0x62   : > { %917 = vmatprep.subr.bf16.mxu0 %v1208_v0  ;;  %921 = vmatprep.mubr.msk.bf16.mxu0 %vm1209_vm0, %v1208_v0  ;;  %v341_v3 = vld [vmem:[%s293_s25] sm:$0xff]  ;;  %vm366_vm1 = vcmask 261120   ;;  %v1210_v21 = vmov 683565275   ;;  %v1211_v23 = vmov 2475754826  }
  0x63   : > { %925 = vmatprep.subr.bf16.mxu1 %v1208_v0  ;;  %929 = vmatprep.mubr.msk.bf16.mxu1 %vm1209_vm0, %v1208_v0  ;;  %v342_v4 = vpack.c.bf16 %v341_v3, %v341_v3  ;;  %v887_v5 = vld [vmem:[%s1487_s2] ss:$0 sm:$0xff]  ;;  %v1212_v26 = vmov 2131351028   ;;  %v1213_v29 = vmov 2102212464  }
  0x64   : > { %918 = vmatpush3.bf16.msra.mxu0 %v1034_v1  ;;  %v1214_v32 = vmov 920167782   ;;  %v1215_v35 = vmov 1326507024   ;;  %s340_s21 = sld [smem:[#allocation2]]  ;;  %p335_p1 = scmp.lt.s32.totalorder %s1278_s6, 1 }
  0x65   : > { %919 = vmatprep.subr.bf16.mxu0 %v1208_v0 }
  0x66   : > { %s1511_s6 = smov (!%p335_p1, %s1278_s6), 1 }
  0x67   : > { %s886_s24 = sshll.u32 %s1511_s6, 3 }
  0x68   : > { %920 = vmatpush3.bf16.msra.mxu0 %v1035_v2  ;;  %s338_s9 = scalar_lea.vmem %s1492_s7, %s886_s24 }
  0x69   : > { %933 = vmatprep.subr.mxu0 %v1208_v0 }
  0x6b   : > { %922 = vmatmul.mubr.msk.bf16.vlgmr.msra.gmra.mxu0 %vm366_vm1, %v342_v4 }
  0x6c   : > { %941 = vmatprep.mubr.msk.f32.mxu0 %vm1209_vm0, %v1208_v0 }
 0x12b   : > { %v404_v6 = vpop.f32.mrf.mxu0 }
 0x12c   : > { %v1392_v7 = vadd.f32 %v887_v5, %v404_v6 }
 0x12d   : > { %v923_v8 = vpop.f32.mrf.mxu0 }
 0x12e   : > { %v413_v9 = vand.u32 2139095040, %v1392_v7  ;;  %v410_v15 = vand.u32 2147483647, %v1392_v7  ;;  %vm412_vm9 = vcmp.lt.s32.totalorder %v1392_v7, 0  ;;  %vm502_vm14 = vweird.f32 %v1392_v7 }
 0x12f   : > { %v407_v10 = vpop.f32.mrf.mxu0 }
 0x130   : > { %v414_v11 = vshrl.u32 %v413_v9, 23  ;;  %v417_v18 = vand.u32 8388607, %v410_v15  ;;  %vm411_vm10 = vcmp.le.f32.partialorder %v410_v15, 0.7853982 }
 0x131   : > { %v924_v12 = vpop.f32.mrf.mxu0 }
 0x132   : > { %v891_v13 = vadd.s32 4294967169, %v414_v11  ;;  %v418_v37 = vor.u32 8388608, %v417_v18 }
 0x134   : > { %v420_v14 = vadd.s32 1, %v891_v13  ;;  %v458_v51 = vshll.u32 %v418_v37, 8 }
 0x136   : > { %vm421_vm2 = vcmp.gt.s32.totalorder %v420_v14, 0 }
 0x137   : > { %v422_v16 = vsel %vm421_vm2, %v420_v14, 0 }
 0x138   : > { %v424_v17 = vand.u32 31, %v422_v16  ;;  %v423_v20 = vshrl.u32 %v422_v16, 5 }
 0x13a   : > { %v425_v19 = vsub.s32 32, %v424_v17  ;;  %v427_v22 = vshll.u32 %v1210_v21, %v424_v17  ;;  %v430_v24 = vshll.u32 %v1211_v23, %v424_v17  ;;  %v433_v28 = vshll.u32 %v1212_v26, %v424_v17 }
 0x13b   : > { %v436_v31 = vshll.u32 %v1213_v29, %v424_v17  ;;  %v439_v34 = vshll.u32 %v1214_v32, %v424_v17  ;;  %vm442_vm3 = vcmp.lt.s32.totalorder %v423_v20, 1  ;;  %vm445_vm4 = vcmp.lt.s32.totalorder %v423_v20, 4 }
 0x13c   : > { %v428_v25 = vshrl.u32 %v1211_v23, %v425_v19  ;;  %v431_v27 = vshrl.u32 %v1212_v26, %v425_v19  ;;  %v434_v30 = vshrl.u32 %v1213_v29, %v425_v19  ;;  %v437_v33 = vshrl.u32 %v1214_v32, %v425_v19 }
 0x13d   : > { %v440_v36 = vshrl.u32 %v1215_v35, %v425_v19  ;;  %v426_v46 = vshrl.u32 %v1210_v21, %v425_v19  ;;  %vm444_vm5 = vcmp.lt.s32.totalorder %v423_v20, 3  ;;  %vm443_vm6 = vcmp.lt.s32.totalorder %v423_v20, 2 }
 0x13e   : > { %v429_v38 = vor.u32 %v428_v25, %v427_v22  ;;  %v432_v39 = vor.u32 %v431_v27, %v430_v24  ;;  %v435_v40 = vor.u32 %v434_v30, %v433_v28  ;;  %v438_v41 = vor.u32 %v437_v33, %v436_v31 }
 0x13f   : > { %v441_v42 = vor.u32 %v440_v36, %v439_v34 }
 0x140   : > { %v447_v43 = vsel %vm445_vm4, %v435_v40, 2102212464  ;;  %v450_v44 = vsel %vm442_vm3, %v429_v38, %v432_v39  ;;  %v454_v45 = vsel %vm442_vm3, %v432_v39, %v435_v40  ;;  %v451_v47 = vsel %vm445_vm4, %v438_v41, 920167782 }
 0x141   : > { %v455_v48 = vsel %vm445_vm4, %v441_v42, 1326507024  ;;  %v452_v49 = vsel %vm444_vm5, %v435_v40, %v451_v47  ;;  %v446_v52 = vsel %vm442_vm3, %v426_v46, %v429_v38  ;;  %v448_v53 = vsel %vm444_vm5, %v432_v39, %v447_v43 }
 0x142   : > { %v456_v50 = vsel %vm444_vm5, %v438_v41, %v455_v48  ;;  %v453_v54 = vsel %vm443_vm6, %v450_v44, %v452_v49  ;;  %v449_v60 = vsel %vm443_vm6, %v446_v52, %v448_v53  ;;  %v1036_v48 = vld [vmem:[#allocation7 + $0x8] sm:$0xff]   ;;  %v1037_v49 = vld [vmem:[#allocation7] sm:$0xff]   ;;  %v520_v52 = vstv %s340_s21 }
 0x143   : > { %v457_v55 = vsel %vm443_vm6, %v454_v45, %v456_v50  ;;  %v1412_v58 = vmul.u32.u64.low %v458_v51, %v453_v54  ;;  %v1413_v59 = vmul.u32.u64.high %v458_v51, %v453_v54, %v1412_v58  ;;  %v465_v62 = vmul.u32 %v458_v51, %v449_v60  ;;  %926 = vmatpush3.bf16.msra.mxu1 %v1036_v48 }
 0x144   : > { %v1409_v56 = vmul.u32.u64.low %v458_v51, %v457_v55  ;;  %v1410_v57 = vmul.u32.u64.high %v458_v51, %v457_v55, %v1409_v56  ;;  %927 = vmatprep.subr.bf16.mxu1 %v1208_v0 }
 0x145   : > { %v468_v61 = vadd.s32 1, %v1413_v59  ;;  %v895_v56 = vld [vmem:[%s1489_s4] ss:$0 sm:$0xff] }
 0x146   : > { %vm467_vm7 = vc.u32 %v1410_v57, %v1412_v58  ;;  %v466_v12 = vadd.s32 %v1412_v58, %v1410_v57 }
 0x147   : > { %v469_v63 = vsel %vm467_vm7, %v468_v61, %v1413_v59  ;;  %928 = vmatpush3.bf16.msra.mxu1 %v1037_v49 }
 0x148   : > { %v470_v1 = vadd.s32 %v469_v63, %v465_v62 }
 0x14a   : > { %v471_v2 = vadd.s32 536870912, %v470_v1 }
 0x14c   : > { %v472_v3 = vshrl.u32 %v471_v2, 30 }
 0x14e   : > { %v473_v4 = vshll.u32 %v472_v3, 30  ;;  %v496_v30 = vsub.s32 4, %v472_v3 }
 0x150   : > { %v474_v5 = vsub.s32 %v470_v1, %v473_v4  ;;  %v497_v34 = vsel %vm412_vm9, %v496_v30, %v472_v3 }
 0x151   : > { %v499_v36 = vsel %vm411_vm10, 0, %v497_v34 }
 0x152   : > { %v476_v6 = vsub.s32 0, %v474_v5  ;;  %v503_v37 = vadd.s32 3, %v499_v36 }
 0x154   : > { %v892_v8 = vmin.u32 %v476_v6, %v474_v5  ;;  %v504_v38 = vand.u32 3, %v503_v37 }
 0x156   : > { %v478_v9 = vclz %v892_v8  ;;  %vm509_vm11 = vcmp.eq.s32.totalorder %v504_v38, 2  ;;  %vm506_vm12 = vcmp.eq.s32.totalorder %v504_v38, 0  ;;  %vm505_vm13 = vcmp.lt.s32.totalorder %v504_v38, 2 }
 0x158   : > { %v893_v10 = vadd.s32 4294967294, %v478_v9 }
 0x15a   : > { %vm894_vm8 = vcmp.lt.s32.totalorder %v893_v10, 0 }
 0x15b   : > { %v481_v11 = vsel %vm894_vm8, 0, %v893_v10 }
 0x15c   : > { %v482_v13 = vsub.s32 32, %v481_v11  ;;  %v486_v14 = vsub.s32 4294967266, %v481_v11  ;;  %v483_v16 = vshll.u32 %v474_v5, %v481_v11 }
 0x15e   : > { %v484_v17 = vshrl.u32 %v466_v12, %v482_v13  ;;  %v487_v18 = vadd.s32 127, %v486_v14 }
 0x160   : > { %v485_v19 = vor.u32 %v484_v17, %v483_v16  ;;  %v488_v20 = vshll.u32 %v487_v18, 23 }
 0x162   : > { %v489_v22 = vor.u32 4788187, %v488_v20  ;;  %v492_v25 = vcvt.s32.f32 %v485_v19 }
 0x164   : > { %v490_v24 = vand.u32 2147483647, %v489_v22 }
 0x166   : > { %v493_v27 = vmul.f32 %v492_v25, %v490_v24 }
 0x168   : > { %v494_v28 = vxor.u32 2147483648, %v493_v27 }
 0x16a   : > { %v495_v31 = vsel %vm412_vm9, %v494_v28, %v493_v27 }
 0x16b   : > { %v498_v33 = vsel %vm411_vm10, %v1392_v7, %v495_v31 }
 0x16c   : > { %1038 = vcosq.f32 %v498_v33 }
 0x16d   : > { %1040 = vsinq.f32 %v498_v33 }
 0x179   : > { %v1039_v39 = vpop.eup %1038 }
 0x17a   : > { %v1041_v40 = vpop.eup %1040  ;;  %v510_v41 = vxor.u32 2147483648, %v1039_v39 }
 0x17b   : > { %v507_v42 = vxor.u32 2147483648, %v1041_v40 }
 0x17c   : > { %v511_v43 = vsel %vm509_vm11, %v510_v41, %v1041_v40 }
 0x17d   : > { %v508_v44 = vsel %vm506_vm12, %v1039_v39, %v507_v42 }
 0x17e   : > { %v512_v15 = vsel %vm505_vm13, %v508_v44, %v511_v43 }
 0x17f   : > { %v513_v45 = vsel %vm502_vm14, nan, %v512_v15 }
 0x180   : > { %v514_v46 = vmul.f32 %v513_v45, %v513_v45 }
 0x182   : > { %v515_v47 = vsel %vm366_vm1, %v514_v46, 0.0 }
 0x183   : > { %516 = vadd.xlane.f32.xlu0 %v515_v47 }
 0x20c   : > { %v517_v50 = vpop.xlane.xlu0 %516 }
 0x20d   : > { %v518_v51 = vmax.f32 %v517_v50, 1e-10 }
 0x20f   : > { %1042 = vrsqrt.f32 %v518_v51 }
 0x21c   : > { %v1043_v53 = vpop.eup %1042 }
 0x21d   : > { %v521_v54 = vmul.f32 %v1043_v53, %v520_v52 }
 0x21f   : > { %v522_v7 = vmul.f32 %v521_v54, %v513_v45 }
 0x221   : > { %v523_v55 = vpack.c.bf16 %v522_v7, %v522_v7 }
 0x223   : > { %930 = vmatmul.mubr.msk.bf16.vlgmr.msra.gmra.mxu1 %vm366_vm1, %v523_v55 }
 0x2e3   : > { %v584_v57 = vpop.f32.mrf.mxu1 }
 0x2e4   : > { %v1430_v58 = vadd.f32 %v895_v56, %v584_v57 }
 0x2e5   : > { %v931_v59 = vpop.f32.mrf.mxu1 }
 0x2e6   : > { %v593_v60 = vand.u32 2139095040, %v1430_v58  ;;  %v590_v3 = vand.u32 2147483647, %v1430_v58  ;;  %vm592_vm7 = vcmp.lt.s32.totalorder %v1430_v58, 0  ;;  %vm682_vm12 = vweird.f32 %v1430_v58 }
 0x2e7   : > { %v587_v61 = vpop.f32.mrf.mxu1 }
 0x2e8   : > { %v594_v62 = vshrl.u32 %v593_v60, 23  ;;  %v597_v6 = vand.u32 8388607, %v590_v3  ;;  %vm591_vm8 = vcmp.le.f32.partialorder %v590_v3, 0.7853982 }
 0x2e9   : > { %v932_v63 = vpop.f32.mrf.mxu1 }
 0x2ea   : > { %v899_v1 = vadd.s32 4294967169, %v594_v62  ;;  %v598_v22 = vor.u32 8388608, %v597_v6 }
 0x2ec   : > { %v600_v2 = vadd.s32 1, %v899_v1 }
 0x2ee   : > { %vm601_vm15 = vcmp.gt.s32.totalorder %v600_v2, 0 }
 0x2ef   : > { %v602_v4 = vsel %vm601_vm15, %v600_v2, 0 }
 0x2f0   : > { %v604_v5 = vand.u32 31, %v602_v4  ;;  %v603_v9 = vshrl.u32 %v602_v4, 5 }
 0x2f2   : > { %v605_v8 = vsub.s32 32, %v604_v5  ;;  %v607_v10 = vshll.u32 %v1210_v21, %v604_v5  ;;  %v610_v11 = vshll.u32 %v1211_v23, %v604_v5  ;;  %v613_v14 = vshll.u32 %v1212_v26, %v604_v5 }
 0x2f3   : > { %v616_v17 = vshll.u32 %v1213_v29, %v604_v5  ;;  %v619_v19 = vshll.u32 %v1214_v32, %v604_v5  ;;  %vm622_vm0 = vcmp.lt.s32.totalorder %v603_v9, 1  ;;  %vm625_vm2 = vcmp.lt.s32.totalorder %v603_v9, 4 }
 0x2f4   : > { %v608_v12 = vshrl.u32 %v1211_v23, %v605_v8  ;;  %v611_v13 = vshrl.u32 %v1212_v26, %v605_v8  ;;  %v614_v16 = vshrl.u32 %v1213_v29, %v605_v8  ;;  %v617_v18 = vshrl.u32 %v1214_v32, %v605_v8 }
 0x2f5   : > { %v620_v20 = vshrl.u32 %v1215_v35, %v605_v8  ;;  %v606_v33 = vshrl.u32 %v1210_v21, %v605_v8  ;;  %vm624_vm3 = vcmp.lt.s32.totalorder %v603_v9, 3  ;;  %vm623_vm4 = vcmp.lt.s32.totalorder %v603_v9, 2 }
 0x2f6   : > { %v609_v24 = vor.u32 %v608_v12, %v607_v10  ;;  %v612_v25 = vor.u32 %v611_v13, %v610_v11  ;;  %v615_v27 = vor.u32 %v614_v16, %v613_v14  ;;  %v618_v28 = vor.u32 %v617_v18, %v616_v17 }
 0x2f7   : > { %v621_v23 = vor.u32 %v620_v20, %v619_v19  ;;  %v638_v35 = vshll.u32 %v598_v22, 8 }
 0x2f8   : > { %v627_v30 = vsel %vm625_vm2, %v615_v27, 2102212464  ;;  %v630_v26 = vsel %vm622_vm0, %v609_v24, %v612_v25  ;;  %v634_v31 = vsel %vm622_vm0, %v612_v25, %v615_v27  ;;  %v631_v29 = vsel %vm625_vm2, %v618_v28, 920167782 }
 0x2f9   : > { %v635_v34 = vsel %vm625_vm2, %v621_v23, 1326507024  ;;  %v632_v32 = vsel %vm624_vm3, %v615_v27, %v631_v29  ;;  %v626_v37 = vsel %vm622_vm0, %v606_v33, %v609_v24  ;;  %v628_v38 = vsel %vm624_vm3, %v612_v25, %v627_v30  ;;  %v704_v23 = vld [vmem:[#allocation8 + $0x18] sm:$0xff]  ;;  %v703_v30 = vld [vmem:[#allocation8 + $0x10] sm:$0xff] }
 0x2fa   : > { %v636_v36 = vsel %vm624_vm3, %v618_v28, %v635_v34  ;;  %v633_v39 = vsel %vm623_vm4, %v630_v26, %v632_v32  ;;  %v629_v15 = vsel %vm623_vm4, %v626_v37, %v628_v38  ;;  %934 = vmatpush3.msra.mxu0 %v704_v23  ;;  %v702_v26 = vld [vmem:[#allocation8 + $0x8] sm:$0xff] }
 0x2fb   : > { %v637_v40 = vsel %vm623_vm4, %v634_v31, %v636_v36  ;;  %v1450_v43 = vmul.u32.u64.low %v638_v35, %v633_v39  ;;  %v1451_v44 = vmul.u32.u64.high %v638_v35, %v633_v39, %v1450_v43  ;;  %v645_v45 = vmul.u32 %v638_v35, %v629_v15  ;;  %935 = vmatprep.subr.mxu0 %v1208_v0  ;;  %v701_v31 = vld [vmem:[#allocation8] sm:$0xff] }
 0x2fc   : > { %v1447_v41 = vmul.u32.u64.low %v638_v35, %v637_v40  ;;  %v1448_v42 = vmul.u32.u64.high %v638_v35, %v637_v40, %v1447_v41  ;;  %936 = vmatpush3.msra.mxu0 %v703_v30 }
 0x2fd   : > { %v648_v21 = vadd.s32 1, %v1451_v44  ;;  %937 = vmatprep.subr.mxu0 %v1208_v0 }
 0x2fe   : > { %vm647_vm5 = vc.u32 %v1448_v42, %v1450_v43  ;;  %v646_v56 = vadd.s32 %v1450_v43, %v1448_v42  ;;  %938 = vmatpush3.msra.mxu0 %v702_v26 }
 0x2ff   : > { %v649_v46 = vsel %vm647_vm5, %v648_v21, %v1451_v44  ;;  %939 = vmatprep.subr.mxu0 %v1208_v0 }
 0x300   : > { %v650_v47 = vadd.s32 %v649_v46, %v645_v45  ;;  %940 = vmatpush3.msra.mxu0 %v701_v31 }
 0x302   : > { %v651_v48 = vadd.s32 536870912, %v650_v47 }
 0x304   : > { %v652_v49 = vshrl.u32 %v651_v48, 30 }
 0x306   : > { %v653_v50 = vshll.u32 %v652_v49, 30  ;;  %v676_v9 = vsub.s32 4, %v652_v49 }
 0x308   : > { %v654_v51 = vsub.s32 %v650_v47, %v653_v50  ;;  %v677_v12 = vsel %vm592_vm7, %v676_v9, %v652_v49 }
 0x309   : > { %v679_v13 = vsel %vm591_vm8, 0, %v677_v12 }
 0x30a   : > { %v656_v52 = vsub.s32 0, %v654_v51  ;;  %v683_v14 = vadd.s32 3, %v679_v13 }
 0x30c   : > { %v900_v53 = vmin.u32 %v656_v52, %v654_v51  ;;  %v684_v16 = vand.u32 3, %v683_v14 }
 0x30e   : > { %v658_v54 = vclz %v900_v53  ;;  %vm689_vm9 = vcmp.eq.s32.totalorder %v684_v16, 2  ;;  %vm686_vm10 = vcmp.eq.s32.totalorder %v684_v16, 0  ;;  %vm685_vm11 = vcmp.lt.s32.totalorder %v684_v16, 2 }
 0x310   : > { %v901_v7 = vadd.s32 4294967294, %v658_v54 }
 0x312   : > { %vm902_vm6 = vcmp.lt.s32.totalorder %v901_v7, 0 }
 0x313   : > { %v661_v55 = vsel %vm902_vm6, 0, %v901_v7 }
 0x314   : > { %v662_v57 = vsub.s32 32, %v661_v55  ;;  %v666_v59 = vsub.s32 4294967266, %v661_v55  ;;  %v663_v60 = vshll.u32 %v654_v51, %v661_v55 }
 0x316   : > { %v664_v61 = vshrl.u32 %v646_v56, %v662_v57  ;;  %v667_v62 = vadd.s32 127, %v666_v59 }
 0x318   : > { %v665_v63 = vor.u32 %v664_v61, %v663_v60  ;;  %v668_v1 = vshll.u32 %v667_v62, 23 }
 0x31a   : > { %v669_v2 = vor.u32 4788187, %v668_v1  ;;  %v672_v5 = vcvt.s32.f32 %v665_v63 }
 0x31c   : > { %v670_v4 = vand.u32 2147483647, %v669_v2 }
 0x31e   : > { %v673_v6 = vmul.f32 %v672_v5, %v670_v4 }
 0x320   : > { %v674_v8 = vxor.u32 2147483648, %v673_v6 }
 0x322   : > { %v675_v10 = vsel %vm592_vm7, %v674_v8, %v673_v6 }
 0x323   : > { %v678_v11 = vsel %vm591_vm8, %v1430_v58, %v675_v10 }
 0x324   : > { %1044 = vcosq.f32 %v678_v11 }
 0x325   : > { %1046 = vsinq.f32 %v678_v11 }
 0x331   : > { %v1045_v17 = vpop.eup %1044 }
 0x332   : > { %v1047_v18 = vpop.eup %1046  ;;  %v690_v19 = vxor.u32 2147483648, %v1045_v17 }
 0x333   : > { %v687_v20 = vxor.u32 2147483648, %v1047_v18 }
 0x334   : > { %v691_v22 = vsel %vm689_vm9, %v690_v19, %v1047_v18 }
 0x335   : > { %v688_v24 = vsel %vm686_vm10, %v1045_v17, %v687_v20 }
 0x336   : > { %v692_v3 = vsel %vm685_vm11, %v688_v24, %v691_v22 }
 0x337   : > { %v693_v25 = vsel %vm682_vm12, nan, %v692_v3 }
 0x338   : > { %v694_v27 = vmul.f32 %v693_v25, %v693_v25 }
 0x33a   : > { %v695_v28 = vsel %vm366_vm1, %v694_v27, 0.0 }
 0x33b   : > { %696 = vadd.xlane.f32.xlu0 %v695_v28 }
 0x3c4   : > { %v697_v58 = vpop.xlane.xlu0 %696 }
 0x3c5   : > { %v698_v33 = vmax.f32 %v697_v58, 1e-10 }
 0x3c7   : > { %1048 = vrsqrt.f32 %v698_v33 }
 0x3d4   : > { %v1049_v29 = vpop.eup %1048 }
 0x3d5   : > { %v700_v34 = vmul.f32 %v1049_v29, %v693_v25 }
 0x3d7   : > { %942 = vmatmul.mubr.msk.f32.vlgmr.msra.gmra.mxu0 %vm366_vm1, %v700_v34 }
 0x497   : > { %v774_v32 = vpop.f32.mrf.mxu0 }
 0x498   : > { %778 = vst [vmem:[%s338_s9] sm:$0xff] %v774_v32 }
 0x499   : > { %v943_v36 = vpop.f32.mrf.mxu0 }
 0x49a PF: > { %p20_p4 = scmp.ge.s32.totalorder %s1329_s12, 4   ;;  %s1506_s26 = smov %s1190_s27 }
 0x49b   : > { %s1507_s27 = smov %s1194_s28  ;;  %s1508_s28 = smov %s1339_s16 }
 0x49c   : > { %s1509_s29 = smov %s1329_s12  ;;  %22 = sbr.rel (!%p20_p4) target bundleno = 7 (0x7), region = 100 }
 0x4a1   :  { %798 = vsyncpa [#allocation4], 1 }
 0x4a2   :  { %800 = vsyncpa [#allocation4 + $0x1], 1 }
 0x4a3   :  { %801 = vsyncpa [#allocation6], 1 }
 0x4a4   :  { %802 = vsyncpa [#allocation9], 1 }

// kernel: generate_parameters_forward.1
= control target key start
LH: loop header
LB: loop body
LE: loop exit
PB: predicated region body
PF: predicated region fallthrough
CT: control target
= control target key end

     0   :  { %s1485_s0 = inlined_call_operand.hbm [shape: f32[16,32], index: 0, kind: input, shape index: {}]   ;;  %s1486_s1 = inlined_call_operand.hbm [shape: bf16[32,32], index: 1, kind: input, shape index: {}]   ;;  %s1487_s2 = inlined_call_operand.vmem [shape: f32[1,32], index: 2, kind: input, shape index: {}]   ;;  %s1488_s3 = inlined_call_operand.hbm [shape: bf16[32,32], index: 3, kind: input, shape index: {}]   ;;  %s1489_s4 = inlined_call_operand.vmem [shape: f32[1,32], index: 4, kind: input, shape index: {}]   ;;  %s1490_s5 = inlined_call_operand.hbm [shape: f32[32,128], index: 5, kind: input, shape index: {}]   ;;  %s1491_s6 = inlined_call_operand.<no memory space> [shape: f32[1], index: 6, kind: input, shape index: {}]   ;;  %s1492_s7 = inlined_call_operand.vmem [shape: f32[16,128], index: 7, kind: output, shape index: {}]  }
   0x1   :  { %12 = sst [smem:[#allocation2]] %s1491_s6 }
   0x2   :  { %13 = vsyncpa [#allocation4], 0 }
   0x3   :  { %15 = vsyncpa [#allocation4 + $0x1], 0 }
   0x4   :  { %16 = vsyncpa [#allocation6], 0 }
   0x5   :  { %17 = vsyncpa [#allocation9], 0  ;;  %s1259_s26 = smov 0   ;;  %s1261_s27 = smov 0  }
   0x6   :  { %s1263_s28 = smov 0   ;;  %s1265_s29 = smov 0  }
   0x7 LB: > { %s1278_s6 = sadd.s32 4294967295, %s1198_s29   ;;  %p43_p0 = scmp.ne.s32.totalorder %s1190_s27, %s1186_s26  ;;  %s1198_s29 = sphi %s1265_s29, %s1509_s29   ;;  %s1194_s28 = sphi %s1263_s28, %s1508_s28   ;;  %s1190_s27 = sphi %s1261_s27, %s1507_s27   ;;  %s1186_s26 = sphi %s1259_s26, %s1506_s26  }
   0x8   : > { %p1493_p1 = scmp.eq.s32.totalorder %s1278_s6, 0  ;;  %p874_p2 = scmp.ge.s32.totalorder %s1198_s29, 1 }
   0x9   : > { %p206_p3 = scmp.lt.s32.totalorder %s1198_s29, 3  ;;  %s1200_s9 = smov [#allocation5]  }
   0xa   : > { %p1286_p4 = por %p1493_p1, %p43_p0  ;;  %s218_s10 = sshll.u32 %s1200_s9, 4  ;;  %s219_s10 = int_to_ptr.vmem [resolvable:$true] %s218_s10 }
   0xb   : > { %p1290_p5 = pnand %p874_p2, %p206_p3  ;;  %s1201_s12 = smov [#allocation7]  }
   0xc   : > { %s1496_s30 = scalar_select %p1286_p4, 1, 0 }
   0xd   : > { %s1497_s8 = scalar_select %p1290_p5, 1, 0 }
   0xe   : > { %p966_p6 = pneg %p1290_p5  ;;  %s234_s13 = sshll.u32 %s1201_s12, 4  ;;  %s235_s13 = int_to_ptr.vmem [resolvable:$true] %s234_s13 }
   0xf   : > { %s1202_s14 = smov [#allocation8]   ;;  %s1061_s16 = scalar_lea.vmem %s219_s10, 256 }
  0x10   : > { %p1298_p7 = pnand %p966_p6, %p1493_p1  ;;  %s250_s15 = sshll.u32 %s1202_s14, 4  ;;  %s251_s15 = int_to_ptr.vmem [resolvable:$true] %s250_s15 }
  0x11   : > { %p1062_p9 = scmp.ne.s32.totalorder %s219_s10, %s1061_s16  ;;  %p1069_p12 = scmp.lt.s32.totalorder %s219_s10, %s219_s10 }
  0x12   : > { %p1052_p8 = pneg %p1298_p7  ;;  %p1070_p13 = scmp.lt.s32.totalorder %s1061_s16, %s1061_s16 }
  0x14   : > { %p1064_p10 = pnand %p1062_p9, %p1052_p8  ;;  %p1071_p0 = por %p1070_p13, %p1069_p12 }
  0x16   : > { %p1065_p11 = pneg %p1064_p10 }
  0x18   : > { %p1072_p2 = pnand %p1071_p0, %p1065_p11 }
  0x1a   : > { %1075 = shalt.err (!%p1072_p2)
}
  0x1b   : > { %s1203_s17 = smov 64   ;;  %s1204_s18 = smov 4  }
  0x1c   : > { %969 = dma.hbm_to_vmem [thread:$0]  (!%p1298_p7), %s1486_s1, 256, %s219_s10, [#allocation6], %s1203_s17, %s1203_s17, %s1204_s18  }
  0x1d   : > { %s1087_s21 = scalar_lea.vmem %s235_s13, 256  ;;  %p1095_p10 = scmp.lt.s32.totalorder %s235_s13, %s235_s13 }
  0x1e   : > { %p1088_p3 = scmp.ne.s32.totalorder %s235_s13, %s1087_s21  ;;  %p1096_p1 = scmp.lt.s32.totalorder %s1087_s21, %s1087_s21 }
  0x20   : > { %p1090_p6 = pnand %p1088_p3, %p1052_p8  ;;  %p1097_p12 = por %p1096_p1, %p1095_p10 }
  0x22   : > { %p1091_p9 = pneg %p1090_p6 }
  0x24   : > { %p1098_p11 = pnand %p1097_p12, %p1091_p9 }
  0x26   : > { %1101 = shalt.err (!%p1098_p11)
}
  0x27   : > { %972 = dma.hbm_to_vmem [thread:$0]  (!%p1298_p7), %s1488_s3, 256, %s235_s13, [#allocation6], %s1203_s17, %s1203_s17, %s1204_s18  }
  0x28   : > { %s1113_s24 = scalar_lea.vmem %s251_s15, 512  ;;  %p1121_p3 = scmp.lt.s32.totalorder %s251_s15, %s251_s15 }
  0x29   : > { %p1114_p13 = scmp.ne.s32.totalorder %s251_s15, %s1113_s24  ;;  %p1122_p6 = scmp.lt.s32.totalorder %s1113_s24, %s1113_s24 }
  0x2b   : > { %p1116_p0 = pnand %p1114_p13, %p1052_p8  ;;  %p1123_p4 = por %p1122_p6, %p1121_p3 }
  0x2d   : > { %p1117_p2 = pneg %p1116_p0 }
  0x2f   : > { %p1124_p1 = pnand %p1123_p4, %p1117_p2 }
  0x31   : > { %1127 = shalt.err (!%p1124_p1)
}
  0x32   : > { %s1205_s25 = smov 128   ;;  %s1206_s26 = smov 8  }
  0x33   : > { %975 = dma.hbm_to_vmem [thread:$0]  (!%p1298_p7), %s1490_s5, 512, %s251_s15, [#allocation9], %s1205_s25, %s1205_s25, %s1206_s26  }
  0x34   : > { %s1329_s12 = sadd.s32 1, %s1198_s29   ;;  %s30_s14 = sadd.s32 1, %s1194_s28 }
  0x35   : > { %s27_s13 = ssub.s32 %s1198_s29, %s1329_s12  ;;  %p37_p8 = scmp.ne.s32.totalorder %s1194_s28, %s1190_s27 }
  0x36   : > { %p28_p4 = scmp.eq.s32.totalorder %s27_s13, 0  ;;  %p38_p9 = scmp.eq.s32.totalorder %s1198_s29, 0 }
  0x37   : > { %p983_p10 = scmp.lt.s32.totalorder %s1198_s29, 2  ;;  %s267_s17 = sand.u32 1, %s1194_s28  }
  0x38   : > { %s1339_s16 = scalar_select %p28_p4, %s1194_s28, %s30_s14  }
  0x39   : > { %p39_p12 = por %p38_p9, %p37_p8  ;;  %s879_s18 = sshll.u32 %s267_s17, 3 }
  0x3a   : > { %s880_s19 = sshll.u32 %s1198_s29, 7  ;;  %s271_s15 = scalar_lea.vmem [#allocation3], %s879_s18 }
  0x3b   : > { %s1346_s21 = scalar_lea.hbm %s1485_s0, %s880_s19  ;;  %s278_s22 = sshll.u32 %s271_s15, 4  ;;  %s279_s22 = int_to_ptr.vmem [resolvable:$true] %s278_s22 }
  0x3c   : > { %p1348_p7 = pnand %p983_p10, %p39_p12  ;;  %s268_s24 = scalar_lea.sflag [#allocation4], %s267_s17 }
  0x3d   : > { %s1128_s25 = scalar_lea.hbm %s1346_s21, 128  ;;  %s1133_s9 = scalar_lea.hbm %s1485_s0, 256 }
  0x3e   : > { %p1129_p11 = scmp.ne.s32.totalorder %s1346_s21, %s1128_s25  ;;  %p1130_p13 = pneg %p1348_p7 }
  0x3f   : > { %p1134_p3 = scmp.lt.s32.totalorder %s1346_s21, %s1485_s0  ;;  %p1135_p6 = scmp.lt.s32.totalorder %s1133_s9, %s1128_s25 }
  0x40   : > { %p1131_p0 = pnand %p1130_p13, %p1129_p11 }
  0x41   : > { %p1136_p1 = por %p1135_p6, %p1134_p3 }
  0x42   : > { %p1132_p2 = pneg %p1131_p0 }
  0x44   : > { %p1137_p4 = pnand %p1136_p1, %p1132_p2 }
  0x46   : > { %1140 = shalt.err (!%p1137_p4)
}
  0x47   : > { %s1141_s14 = scalar_lea.vmem %s279_s22, 128  ;;  %s1207_s17 = smov [#allocation3]  }
  0x48   : > { %p1142_p8 = scmp.ne.s32.totalorder %s279_s22, %s1141_s14  ;;  %s1146_s18 = sshll.u32 %s1207_s17, 4  ;;  %s1147_s18 = int_to_ptr.vmem [resolvable:$false] %s1146_s18 }
  0x49   : > { %s1148_s19 = scalar_lea.vmem %s1147_s18, 256  ;;  %p1149_p12 = scmp.lt.s32.totalorder %s279_s22, %s1147_s18 }
  0x4a   : > { %p1144_p9 = pnand %p1142_p8, %p1130_p13  ;;  %p1150_p11 = scmp.lt.s32.totalorder %s1148_s19, %s1141_s14 }
  0x4c   : > { %p1145_p10 = pneg %p1144_p9  ;;  %p1151_p0 = por %p1150_p11, %p1149_p12 }
  0x4e   : > { %p1152_p5 = pnand %p1151_p0, %p1145_p10 }
  0x50   : > { %1155 = shalt.err (!%p1152_p5)
}
  0x51   : > { %979 = dma.hbm_to_vmem [thread:$0]  (!%p1348_p7), %s1346_s21, 128, %s279_s22, %s268_s24  }
  0x52   : > { %p1500_p2 = scmp.ne.s32.totalorder %s1497_s8, 0 }
  0x53   : > { %s289_s11 = sand.u32 (!%p1500_p2), 1, %s1190_s27   ;;  %p1501_p13 = scmp.ne.s32.totalorder (!%p1500_p2), %s1496_s30, 0 }
  0x54   : > { %287 = sbr.rel (%p1500_p2) target bundleno = 1178 (0x49a), region = 48  ;;  %s882_s20 = sshll.u32 (!%p1500_p2), %s289_s11, 3 }
  0x55   : > { %s290_s15 = scalar_lea.sflag (!%p1500_p2), [#allocation4], %s289_s11  ;;  %s293_s25 = scalar_lea.vmem (!%p1500_p2), [#allocation3], %s882_s20 }
  0x59   : > { %1173 = dma.done.wait (%p1501_p13), %s290_s15, 128  }
  0x5a   : > { %1175 = vsyncadd (%p1501_p13), %s290_s15, 4294967168  ;;  %p1502_p5 = scmp.eq.s32.totalorder %s1278_s6, 0 }
  0x5c   : > { %1177 = dma.done.wait (%p1502_p5), [#allocation6], 512   ;;  %p1503_p3 = pmov %p1502_p5 }
  0x5e   : > { %1179 = vsyncadd (%p1503_p3), [#allocation6], 4294966784  ;;  %p1504_p7 = pmov %p1503_p3 }
  0x5f   : > { %p1505_p6 = pmov %p1503_p3 }
  0x60   : > { %1181 = dma.done.wait (%p1504_p7), [#allocation9], 512  }
  0x61   : > { %1183 = vsyncadd (%p1505_p6), [#allocation9], 4294966784  ;;  %v1208_v0 = vmov 0.0   ;;  %vm1209_vm0 = vmmov 0   ;;  %v1034_v1 = vld [vmem:[#allocation5 + $0x8] sm:$0xff]   ;;  %v1035_v2 = vld [vmem:[#allocation5] sm:$0xff]  }
  0x62   : > { %917 = vmatprep.subr.bf16.mxu0 %v1208_v0  ;;  %921 = vmatprep.mubr.msk.bf16.mxu0 %vm1209_vm0, %v1208_v0  ;;  %v341_v3 = vld [vmem:[%s293_s25] sm:$0xff]  ;;  %vm366_vm1 = vcmask 261120   ;;  %v1210_v21 = vmov 683565275   ;;  %v1211_v23 = vmov 2475754826  }
  0x63   : > { %925 = vmatprep.subr.bf16.mxu1 %v1208_v0  ;;  %929 = vmatprep.mubr.msk.bf16.mxu1 %vm1209_vm0, %v1208_v0  ;;  %v342_v4 = vpack.c.bf16 %v341_v3, %v341_v3  ;;  %v887_v5 = vld [vmem:[%s1487_s2] ss:$0 sm:$0xff]  ;;  %v1212_v26 = vmov 2131351028   ;;  %v1213_v29 = vmov 2102212464  }
  0x64   : > { %918 = vmatpush3.bf16.msra.mxu0 %v1034_v1  ;;  %v1214_v32 = vmov 920167782   ;;  %v1215_v35 = vmov 1326507024   ;;  %s340_s21 = sld [smem:[#allocation2]]  ;;  %p335_p1 = scmp.lt.s32.totalorder %s1278_s6, 1 }
  0x65   : > { %919 = vmatprep.subr.bf16.mxu0 %v1208_v0 }
  0x66   : > { %s1511_s6 = smov (!%p335_p1, %s1278_s6), 1 }
  0x67   : > { %s886_s24 = sshll.u32 %s1511_s6, 3 }
  0x68   : > { %920 = vmatpush3.bf16.msra.mxu0 %v1035_v2  ;;  %s338_s9 = scalar_lea.vmem %s1492_s7, %s886_s24 }
  0x69   : > { %933 = vmatprep.subr.mxu0 %v1208_v0 }
  0x6b   : > { %922 = vmatmul.mubr.msk.bf16.vlgmr.msra.gmra.mxu0 %vm366_vm1, %v342_v4 }
  0x6c   : > { %941 = vmatprep.mubr.msk.f32.mxu0 %vm1209_vm0, %v1208_v0 }
 0x12b   : > { %v404_v6 = vpop.f32.mrf.mxu0 }
 0x12c   : > { %v1392_v7 = vadd.f32 %v887_v5, %v404_v6 }
 0x12d   : > { %v923_v8 = vpop.f32.mrf.mxu0 }
 0x12e   : > { %v413_v9 = vand.u32 2139095040, %v1392_v7  ;;  %v410_v15 = vand.u32 2147483647, %v1392_v7  ;;  %vm412_vm9 = vcmp.lt.s32.totalorder %v1392_v7, 0  ;;  %vm502_vm14 = vweird.f32 %v1392_v7 }
 0x12f   : > { %v407_v10 = vpop.f32.mrf.mxu0 }
 0x130   : > { %v414_v11 = vshrl.u32 %v413_v9, 23  ;;  %v417_v18 = vand.u32 8388607, %v410_v15  ;;  %vm411_vm10 = vcmp.le.f32.partialorder %v410_v15, 0.7853982 }
 0x131   : > { %v924_v12 = vpop.f32.mrf.mxu0 }
 0x132   : > { %v891_v13 = vadd.s32 4294967169, %v414_v11  ;;  %v418_v37 = vor.u32 8388608, %v417_v18 }
 0x134   : > { %v420_v14 = vadd.s32 1, %v891_v13  ;;  %v458_v51 = vshll.u32 %v418_v37, 8 }
 0x136   : > { %vm421_vm2 = vcmp.gt.s32.totalorder %v420_v14, 0 }
 0x137   : > { %v422_v16 = vsel %vm421_vm2, %v420_v14, 0 }
 0x138   : > { %v424_v17 = vand.u32 31, %v422_v16  ;;  %v423_v20 = vshrl.u32 %v422_v16, 5 }
 0x13a   : > { %v425_v19 = vsub.s32 32, %v424_v17  ;;  %v427_v22 = vshll.u32 %v1210_v21, %v424_v17  ;;  %v430_v24 = vshll.u32 %v1211_v23, %v424_v17  ;;  %v433_v28 = vshll.u32 %v1212_v26, %v424_v17 }
 0x13b   : > { %v436_v31 = vshll.u32 %v1213_v29, %v424_v17  ;;  %v439_v34 = vshll.u32 %v1214_v32, %v424_v17  ;;  %vm442_vm3 = vcmp.lt.s32.totalorder %v423_v20, 1  ;;  %vm445_vm4 = vcmp.lt.s32.totalorder %v423_v20, 4 }
 0x13c   : > { %v428_v25 = vshrl.u32 %v1211_v23, %v425_v19  ;;  %v431_v27 = vshrl.u32 %v1212_v26, %v425_v19  ;;  %v434_v30 = vshrl.u32 %v1213_v29, %v425_v19  ;;  %v437_v33 = vshrl.u32 %v1214_v32, %v425_v19 }
 0x13d   : > { %v440_v36 = vshrl.u32 %v1215_v35, %v425_v19  ;;  %v426_v46 = vshrl.u32 %v1210_v21, %v425_v19  ;;  %vm444_vm5 = vcmp.lt.s32.totalorder %v423_v20, 3  ;;  %vm443_vm6 = vcmp.lt.s32.totalorder %v423_v20, 2 }
 0x13e   : > { %v429_v38 = vor.u32 %v428_v25, %v427_v22  ;;  %v432_v39 = vor.u32 %v431_v27, %v430_v24  ;;  %v435_v40 = vor.u32 %v434_v30, %v433_v28  ;;  %v438_v41 = vor.u32 %v437_v33, %v436_v31 }
 0x13f   : > { %v441_v42 = vor.u32 %v440_v36, %v439_v34 }
 0x140   : > { %v447_v43 = vsel %vm445_vm4, %v435_v40, 2102212464  ;;  %v450_v44 = vsel %vm442_vm3, %v429_v38, %v432_v39  ;;  %v454_v45 = vsel %vm442_vm3, %v432_v39, %v435_v40  ;;  %v451_v47 = vsel %vm445_vm4, %v438_v41, 920167782 }
 0x141   : > { %v455_v48 = vsel %vm445_vm4, %v441_v42, 1326507024  ;;  %v452_v49 = vsel %vm444_vm5, %v435_v40, %v451_v47  ;;  %v446_v52 = vsel %vm442_vm3, %v426_v46, %v429_v38  ;;  %v448_v53 = vsel %vm444_vm5, %v432_v39, %v447_v43 }
 0x142   : > { %v456_v50 = vsel %vm444_vm5, %v438_v41, %v455_v48  ;;  %v453_v54 = vsel %vm443_vm6, %v450_v44, %v452_v49  ;;  %v449_v60 = vsel %vm443_vm6, %v446_v52, %v448_v53  ;;  %v1036_v48 = vld [vmem:[#allocation7 + $0x8] sm:$0xff]   ;;  %v1037_v49 = vld [vmem:[#allocation7] sm:$0xff]   ;;  %v520_v52 = vstv %s340_s21 }
 0x143   : > { %v457_v55 = vsel %vm443_vm6, %v454_v45, %v456_v50  ;;  %v1412_v58 = vmul.u32.u64.low %v458_v51, %v453_v54  ;;  %v1413_v59 = vmul.u32.u64.high %v458_v51, %v453_v54, %v1412_v58  ;;  %v465_v62 = vmul.u32 %v458_v51, %v449_v60  ;;  %926 = vmatpush3.bf16.msra.mxu1 %v1036_v48 }
 0x144   : > { %v1409_v56 = vmul.u32.u64.low %v458_v51, %v457_v55  ;;  %v1410_v57 = vmul.u32.u64.high %v458_v51, %v457_v55, %v1409_v56  ;;  %927 = vmatprep.subr.bf16.mxu1 %v1208_v0 }
 0x145   : > { %v468_v61 = vadd.s32 1, %v1413_v59  ;;  %v895_v56 = vld [vmem:[%s1489_s4] ss:$0 sm:$0xff] }
 0x146   : > { %vm467_vm7 = vc.u32 %v1410_v57, %v1412_v58  ;;  %v466_v12 = vadd.s32 %v1412_v58, %v1410_v57 }
 0x147   : > { %v469_v63 = vsel %vm467_vm7, %v468_v61, %v1413_v59  ;;  %928 = vmatpush3.bf16.msra.mxu1 %v1037_v49 }
 0x148   : > { %v470_v1 = vadd.s32 %v469_v63, %v465_v62 }
 0x14a   : > { %v471_v2 = vadd.s32 536870912, %v470_v1 }
 0x14c   : > { %v472_v3 = vshrl.u32 %v471_v2, 30 }
 0x14e   : > { %v473_v4 = vshll.u32 %v472_v3, 30  ;;  %v496_v30 = vsub.s32 4, %v472_v3 }
 0x150   : > { %v474_v5 = vsub.s32 %v470_v1, %v473_v4  ;;  %v497_v34 = vsel %vm412_vm9, %v496_v30, %v472_v3 }
 0x151   : > { %v499_v36 = vsel %vm411_vm10, 0, %v497_v34 }
 0x152   : > { %v476_v6 = vsub.s32 0, %v474_v5  ;;  %v503_v37 = vadd.s32 3, %v499_v36 }
 0x154   : > { %v892_v8 = vmin.u32 %v476_v6, %v474_v5  ;;  %v504_v38 = vand.u32 3, %v503_v37 }
 0x156   : > { %v478_v9 = vclz %v892_v8  ;;  %vm509_vm11 = vcmp.eq.s32.totalorder %v504_v38, 2  ;;  %vm506_vm12 = vcmp.eq.s32.totalorder %v504_v38, 0  ;;  %vm505_vm13 = vcmp.lt.s32.totalorder %v504_v38, 2 }
 0x158   : > { %v893_v10 = vadd.s32 4294967294, %v478_v9 }
 0x15a   : > { %vm894_vm8 = vcmp.lt.s32.totalorder %v893_v10, 0 }
 0x15b   : > { %v481_v11 = vsel %vm894_vm8, 0, %v893_v10 }
 0x15c   : > { %v482_v13 = vsub.s32 32, %v481_v11  ;;  %v486_v14 = vsub.s32 4294967266, %v481_v11  ;;  %v483_v16 = vshll.u32 %v474_v5, %v481_v11 }
 0x15e   : > { %v484_v17 = vshrl.u32 %v466_v12, %v482_v13  ;;  %v487_v18 = vadd.s32 127, %v486_v14 }
 0x160   : > { %v485_v19 = vor.u32 %v484_v17, %v483_v16  ;;  %v488_v20 = vshll.u32 %v487_v18, 23 }
 0x162   : > { %v489_v22 = vor.u32 4788187, %v488_v20  ;;  %v492_v25 = vcvt.s32.f32 %v485_v19 }
 0x164   : > { %v490_v24 = vand.u32 2147483647, %v489_v22 }
 0x166   : > { %v493_v27 = vmul.f32 %v492_v25, %v490_v24 }
 0x168   : > { %v494_v28 = vxor.u32 2147483648, %v493_v27 }
 0x16a   : > { %v495_v31 = vsel %vm412_vm9, %v494_v28, %v493_v27 }
 0x16b   : > { %v498_v33 = vsel %vm411_vm10, %v1392_v7, %v495_v31 }
 0x16c   : > { %1038 = vcosq.f32 %v498_v33 }
 0x16d   : > { %1040 = vsinq.f32 %v498_v33 }
 0x179   : > { %v1039_v39 = vpop.eup %1038 }
 0x17a   : > { %v1041_v40 = vpop.eup %1040  ;;  %v510_v41 = vxor.u32 2147483648, %v1039_v39 }
 0x17b   : > { %v507_v42 = vxor.u32 2147483648, %v1041_v40 }
 0x17c   : > { %v511_v43 = vsel %vm509_vm11, %v510_v41, %v1041_v40 }
 0x17d   : > { %v508_v44 = vsel %vm506_vm12, %v1039_v39, %v507_v42 }
 0x17e   : > { %v512_v15 = vsel %vm505_vm13, %v508_v44, %v511_v43 }
 0x17f   : > { %v513_v45 = vsel %vm502_vm14, nan, %v512_v15 }
 0x180   : > { %v514_v46 = vmul.f32 %v513_v45, %v513_v45 }
 0x182   : > { %v515_v47 = vsel %vm366_vm1, %v514_v46, 0.0 }
 0x183   : > { %516 = vadd.xlane.f32.xlu0 %v515_v47 }
 0x20c   : > { %v517_v50 = vpop.xlane.xlu0 %516 }
 0x20d   : > { %v518_v51 = vmax.f32 %v517_v50, 1e-10 }
 0x20f   : > { %1042 = vrsqrt.f32 %v518_v51 }
 0x21c   : > { %v1043_v53 = vpop.eup %1042 }
 0x21d   : > { %v521_v54 = vmul.f32 %v1043_v53, %v520_v52 }
 0x21f   : > { %v522_v7 = vmul.f32 %v521_v54, %v513_v45 }
 0x221   : > { %v523_v55 = vpack.c.bf16 %v522_v7, %v522_v7 }
 0x223   : > { %930 = vmatmul.mubr.msk.bf16.vlgmr.msra.gmra.mxu1 %vm366_vm1, %v523_v55 }
 0x2e3   : > { %v584_v57 = vpop.f32.mrf.mxu1 }
 0x2e4   : > { %v1430_v58 = vadd.f32 %v895_v56, %v584_v57 }
 0x2e5   : > { %v931_v59 = vpop.f32.mrf.mxu1 }
 0x2e6   : > { %v593_v60 = vand.u32 2139095040, %v1430_v58  ;;  %v590_v3 = vand.u32 2147483647, %v1430_v58  ;;  %vm592_vm7 = vcmp.lt.s32.totalorder %v1430_v58, 0  ;;  %vm682_vm12 = vweird.f32 %v1430_v58 }
 0x2e7   : > { %v587_v61 = vpop.f32.mrf.mxu1 }
 0x2e8   : > { %v594_v62 = vshrl.u32 %v593_v60, 23  ;;  %v597_v6 = vand.u32 8388607, %v590_v3  ;;  %vm591_vm8 = vcmp.le.f32.partialorder %v590_v3, 0.7853982 }
 0x2e9   : > { %v932_v63 = vpop.f32.mrf.mxu1 }
 0x2ea   : > { %v899_v1 = vadd.s32 4294967169, %v594_v62  ;;  %v598_v22 = vor.u32 8388608, %v597_v6 }
 0x2ec   : > { %v600_v2 = vadd.s32 1, %v899_v1 }
 0x2ee   : > { %vm601_vm15 = vcmp.gt.s32.totalorder %v600_v2, 0 }
 0x2ef   : > { %v602_v4 = vsel %vm601_vm15, %v600_v2, 0 }
 0x2f0   : > { %v604_v5 = vand.u32 31, %v602_v4  ;;  %v603_v9 = vshrl.u32 %v602_v4, 5 }
 0x2f2   : > { %v605_v8 = vsub.s32 32, %v604_v5  ;;  %v607_v10 = vshll.u32 %v1210_v21, %v604_v5  ;;  %v610_v11 = vshll.u32 %v1211_v23, %v604_v5  ;;  %v613_v14 = vshll.u32 %v1212_v26, %v604_v5 }
 0x2f3   : > { %v616_v17 = vshll.u32 %v1213_v29, %v604_v5  ;;  %v619_v19 = vshll.u32 %v1214_v32, %v604_v5  ;;  %vm622_vm0 = vcmp.lt.s32.totalorder %v603_v9, 1  ;;  %vm625_vm2 = vcmp.lt.s32.totalorder %v603_v9, 4 }
 0x2f4   : > { %v608_v12 = vshrl.u32 %v1211_v23, %v605_v8  ;;  %v611_v13 = vshrl.u32 %v1212_v26, %v605_v8  ;;  %v614_v16 = vshrl.u32 %v1213_v29, %v605_v8  ;;  %v617_v18 = vshrl.u32 %v1214_v32, %v605_v8 }
 0x2f5   : > { %v620_v20 = vshrl.u32 %v1215_v35, %v605_v8  ;;  %v606_v33 = vshrl.u32 %v1210_v21, %v605_v8  ;;  %vm624_vm3 = vcmp.lt.s32.totalorder %v603_v9, 3  ;;  %vm623_vm4 = vcmp.lt.s32.totalorder %v603_v9, 2 }
 0x2f6   : > { %v609_v24 = vor.u32 %v608_v12, %v607_v10  ;;  %v612_v25 = vor.u32 %v611_v13, %v610_v11  ;;  %v615_v27 = vor.u32 %v614_v16, %v613_v14  ;;  %v618_v28 = vor.u32 %v617_v18, %v616_v17 }
 0x2f7   : > { %v621_v23 = vor.u32 %v620_v20, %v619_v19  ;;  %v638_v35 = vshll.u32 %v598_v22, 8 }
 0x2f8   : > { %v627_v30 = vsel %vm625_vm2, %v615_v27, 2102212464  ;;  %v630_v26 = vsel %vm622_vm0, %v609_v24, %v612_v25  ;;  %v634_v31 = vsel %vm622_vm0, %v612_v25, %v615_v27  ;;  %v631_v29 = vsel %vm625_vm2, %v618_v28, 920167782 }
 0x2f9   : > { %v635_v34 = vsel %vm625_vm2, %v621_v23, 1326507024  ;;  %v632_v32 = vsel %vm624_vm3, %v615_v27, %v631_v29  ;;  %v626_v37 = vsel %vm622_vm0, %v606_v33, %v609_v24  ;;  %v628_v38 = vsel %vm624_vm3, %v612_v25, %v627_v30  ;;  %v704_v23 = vld [vmem:[#allocation8 + $0x18] sm:$0xff]  ;;  %v703_v30 = vld [vmem:[#allocation8 + $0x10] sm:$0xff] }
 0x2fa   : > { %v636_v36 = vsel %vm624_vm3, %v618_v28, %v635_v34  ;;  %v633_v39 = vsel %vm623_vm4, %v630_v26, %v632_v32  ;;  %v629_v15 = vsel %vm623_vm4, %v626_v37, %v628_v38  ;;  %934 = vmatpush3.msra.mxu0 %v704_v23  ;;  %v702_v26 = vld [vmem:[#allocation8 + $0x8] sm:$0xff] }
 0x2fb   : > { %v637_v40 = vsel %vm623_vm4, %v634_v31, %v636_v36  ;;  %v1450_v43 = vmul.u32.u64.low %v638_v35, %v633_v39  ;;  %v1451_v44 = vmul.u32.u64.high %v638_v35, %v633_v39, %v1450_v43  ;;  %v645_v45 = vmul.u32 %v638_v35, %v629_v15  ;;  %935 = vmatprep.subr.mxu0 %v1208_v0  ;;  %v701_v31 = vld [vmem:[#allocation8] sm:$0xff] }
 0x2fc   : > { %v1447_v41 = vmul.u32.u64.low %v638_v35, %v637_v40  ;;  %v1448_v42 = vmul.u32.u64.high %v638_v35, %v637_v40, %v1447_v41  ;;  %936 = vmatpush3.msra.mxu0 %v703_v30 }
 0x2fd   : > { %v648_v21 = vadd.s32 1, %v1451_v44  ;;  %937 = vmatprep.subr.mxu0 %v1208_v0 }
 0x2fe   : > { %vm647_vm5 = vc.u32 %v1448_v42, %v1450_v43  ;;  %v646_v56 = vadd.s32 %v1450_v43, %v1448_v42  ;;  %938 = vmatpush3.msra.mxu0 %v702_v26 }
 0x2ff   : > { %v649_v46 = vsel %vm647_vm5, %v648_v21, %v1451_v44  ;;  %939 = vmatprep.subr.mxu0 %v1208_v0 }
 0x300   : > { %v650_v47 = vadd.s32 %v649_v46, %v645_v45  ;;  %940 = vmatpush3.msra.mxu0 %v701_v31 }
 0x302   : > { %v651_v48 = vadd.s32 536870912, %v650_v47 }
 0x304   : > { %v652_v49 = vshrl.u32 %v651_v48, 30 }
 0x306   : > { %v653_v50 = vshll.u32 %v652_v49, 30  ;;  %v676_v9 = vsub.s32 4, %v652_v49 }
 0x308   : > { %v654_v51 = vsub.s32 %v650_v47, %v653_v50  ;;  %v677_v12 = vsel %vm592_vm7, %v676_v9, %v652_v49 }
 0x309   : > { %v679_v13 = vsel %vm591_vm8, 0, %v677_v12 }
 0x30a   : > { %v656_v52 = vsub.s32 0, %v654_v51  ;;  %v683_v14 = vadd.s32 3, %v679_v13 }
 0x30c   : > { %v900_v53 = vmin.u32 %v656_v52, %v654_v51  ;;  %v684_v16 = vand.u32 3, %v683_v14 }
 0x30e   : > { %v658_v54 = vclz %v900_v53  ;;  %vm689_vm9 = vcmp.eq.s32.totalorder %v684_v16, 2  ;;  %vm686_vm10 = vcmp.eq.s32.totalorder %v684_v16, 0  ;;  %vm685_vm11 = vcmp.lt.s32.totalorder %v684_v16, 2 }
 0x310   : > { %v901_v7 = vadd.s32 4294967294, %v658_v54 }
 0x312   : > { %vm902_vm6 = vcmp.lt.s32.totalorder %v901_v7, 0 }
 0x313   : > { %v661_v55 = vsel %vm902_vm6, 0, %v901_v7 }
 0x314   : > { %v662_v57 = vsub.s32 32, %v661_v55  ;;  %v666_v59 = vsub.s32 4294967266, %v661_v55  ;;  %v663_v60 = vshll.u32 %v654_v51, %v661_v55 }
 0x316   : > { %v664_v61 = vshrl.u32 %v646_v56, %v662_v57  ;;  %v667_v62 = vadd.s32 127, %v666_v59 }
 0x318   : > { %v665_v63 = vor.u32 %v664_v61, %v663_v60  ;;  %v668_v1 = vshll.u32 %v667_v62, 23 }
 0x31a   : > { %v669_v2 = vor.u32 4788187, %v668_v1  ;;  %v672_v5 = vcvt.s32.f32 %v665_v63 }
 0x31c   : > { %v670_v4 = vand.u32 2147483647, %v669_v2 }
 0x31e   : > { %v673_v6 = vmul.f32 %v672_v5, %v670_v4 }
 0x320   : > { %v674_v8 = vxor.u32 2147483648, %v673_v6 }
 0x322   : > { %v675_v10 = vsel %vm592_vm7, %v674_v8, %v673_v6 }
 0x323   : > { %v678_v11 = vsel %vm591_vm8, %v1430_v58, %v675_v10 }
 0x324   : > { %1044 = vcosq.f32 %v678_v11 }
 0x325   : > { %1046 = vsinq.f32 %v678_v11 }
 0x331   : > { %v1045_v17 = vpop.eup %1044 }
 0x332   : > { %v1047_v18 = vpop.eup %1046  ;;  %v690_v19 = vxor.u32 2147483648, %v1045_v17 }
 0x333   : > { %v687_v20 = vxor.u32 2147483648, %v1047_v18 }
 0x334   : > { %v691_v22 = vsel %vm689_vm9, %v690_v19, %v1047_v18 }
 0x335   : > { %v688_v24 = vsel %vm686_vm10, %v1045_v17, %v687_v20 }
 0x336   : > { %v692_v3 = vsel %vm685_vm11, %v688_v24, %v691_v22 }
 0x337   : > { %v693_v25 = vsel %vm682_vm12, nan, %v692_v3 }
 0x338   : > { %v694_v27 = vmul.f32 %v693_v25, %v693_v25 }
 0x33a   : > { %v695_v28 = vsel %vm366_vm1, %v694_v27, 0.0 }
 0x33b   : > { %696 = vadd.xlane.f32.xlu0 %v695_v28 }
 0x3c4   : > { %v697_v58 = vpop.xlane.xlu0 %696 }
 0x3c5   : > { %v698_v33 = vmax.f32 %v697_v58, 1e-10 }
 0x3c7   : > { %1048 = vrsqrt.f32 %v698_v33 }
 0x3d4   : > { %v1049_v29 = vpop.eup %1048 }
 0x3d5   : > { %v700_v34 = vmul.f32 %v1049_v29, %v693_v25 }
 0x3d7   : > { %942 = vmatmul.mubr.msk.f32.vlgmr.msra.gmra.mxu0 %vm366_vm1, %v700_v34 }
 0x497   : > { %v774_v32 = vpop.f32.mrf.mxu0 }
 0x498   : > { %778 = vst [vmem:[%s338_s9] sm:$0xff] %v774_v32 }
 0x499   : > { %v943_v36 = vpop.f32.mrf.mxu0 }
 0x49a PF: > { %p20_p4 = scmp.ge.s32.totalorder %s1329_s12, 4   ;;  %s1506_s26 = smov %s1190_s27 }
 0x49b   : > { %s1507_s27 = smov %s1194_s28  ;;  %s1508_s28 = smov %s1339_s16 }
 0x49c   : > { %s1509_s29 = smov %s1329_s12  ;;  %22 = sbr.rel (!%p20_p4) target bundleno = 7 (0x7), region = 100 }
 0x4a1   :  { %798 = vsyncpa [#allocation4], 1 }
 0x4a2   :  { %800 = vsyncpa [#allocation4 + $0x1], 1 }
 0x4a3   :  { %801 = vsyncpa [#allocation6], 1 }
 0x4a4   :  { %802 = vsyncpa [#allocation9], 1 }

</bundles_post_ra>
